<compile_context>
chip_gen: v5e
topology: v5e:2x2
jax: 0.10.0
libtpu: 0.0.40
codegen_flags: <defaults>
</compile_context>

<pallas_src>
import functools

import jax
import jax.numpy as jnp
from jax.experimental import pallas as pl
from jax.experimental.pallas import tpu as pltpu


# ----------------------------------------------------------------------------
# Pallas kernel: the whole conv_block for NB batch elements per grid step.
# ----------------------------------------------------------------------------
def _conv_block_kernel(H, W, x_ref, w1_ref, b1_ref, w2_ref, b2_ref,
                       w3_ref, b3_ref, gamma_ref, out_ref):
    # Block shapes:
    #   x_ref / out_ref : (NB, C, S) f32, S = H*W (lane axis, multiple of 128)
    #   w*_ref          : (9, C, C) bf16, tap-major: [kh*3 + kw, cout, cin]
    #   b*_ref          : (C, 1) f32
    #   gamma_ref       : (1, 1) f32 in SMEM
    NB, C, S = x_ref.shape

    # --- reflection-shift machinery (hoisted; reused by all convs/batches) ---
    lane = jax.lax.broadcasted_iota(jnp.int32, (C, S), 1)
    if (W & (W - 1)) == 0:                           # power-of-two fast path
        col = jnp.bitwise_and(lane, W - 1)
        row = jnp.right_shift(lane, W.bit_length() - 1)
    else:
        col = jnp.remainder(lane, W)
        row = jnp.floor_divide(lane, W)
    at_left, at_right = col == 0, col == W - 1
    at_top, at_bottom = row == 0, row == H - 1

    def shifted(a, amount, border_mask):
        # result[s] = a[s + amount] (wrap), except on border_mask where the
        # reflected neighbour a[s - amount] is used instead.
        fwd = pltpu.roll(a, (-amount) % S, axis=1)   # fwd[s] = a[s + amount]
        bwd = pltpu.roll(a, amount % S, axis=1)      # bwd[s] = a[s - amount]
        return jnp.where(border_mask, bwd, fwd)

    def shift_h(a, dh):                              # rows, reflect at i=0/H-1
        if dh == 0:
            return a
        return shifted(a, dh * W, at_bottom if dh > 0 else at_top)

    def shift_w(a, dw):                              # cols, reflect at j=0/W-1
        if dw == 0:
            return a
        return shifted(a, dw, at_right if dw > 0 else at_left)

    def leaky(v):
        return jnp.where(v > 0, v, 0.1 * v)

    def conv3x3(a, w_ref, b_ref):
        # a: (C, S) f32.  ReflectionPad2d(1) + 3x3 conv, f32 accumulation.
        acc = None
        for kh in range(3):
            a_h = shift_h(a, kh - 1)                 # H-shift hoisted over kw
            for kw in range(3):
                tap = shift_w(a_h, kw - 1).astype(jnp.bfloat16)      # (C, S)
                part = jnp.dot(w_ref[kh * 3 + kw], tap,
                               preferred_element_type=jnp.float32)   # (C, S)
                acc = part if acc is None else acc + part
        return acc + b_ref[...]                      # (C, S) + (C, 1) bias

    gamma = gamma_ref[0, 0]
    for n in range(NB):                              # static unroll (NB small)
        x = x_ref[n]                                 # (C, S) f32
        h = leaky(conv3x3(x, w1_ref, b1_ref))
        h = leaky(conv3x3(h, w2_ref, b2_ref))
        h = conv3x3(h, w3_ref, b3_ref)
        out_ref[n] = gamma * h + x                   # full-lane (S-wide) store


# ----------------------------------------------------------------------------
# Wrapper: free NCHW -> (N, C, H*W) reshape, tap-major bf16 weights, one
# pallas_call over the batch.
# ----------------------------------------------------------------------------
@functools.partial(jax.jit, static_argnames=("batch_block",))
def conv_block_forward(x_nchw, w1, b1, w2, b2, w3, b3, gamma, batch_block=1):
    """x_nchw: (N, C, H, W) f32; w*: (C, C, 3, 3) spectrally-normalized;
    b*: (C,); gamma: scalar.  Returns (N, C, H, W) f32."""
    N, C, H, W = x_nchw.shape
    S = H * W
    NB = int(batch_block)
    assert N % NB == 0, "batch_block must divide N"
    assert S % 128 == 0, "H*W must be a multiple of 128 (lane-dense layout)"
    for w in (w1, w2, w3):
        assert w.shape == (C, C, 3, 3), "conv_block assumes Cin == Cout == C"

    x = x_nchw.reshape(N, C, S).astype(jnp.float32)

    def tap_major(w):
        # (Cout, Cin, 3, 3) -> (9, Cout, Cin) bf16 with tap index kh*3 + kw.
        return jnp.transpose(w, (2, 3, 0, 1)).reshape(9, C, C).astype(jnp.bfloat16)

    w1m, w2m, w3m = tap_major(w1), tap_major(w2), tap_major(w3)
    b1c = b1.reshape(C, 1).astype(jnp.float32)
    b2c = b2.reshape(C, 1).astype(jnp.float32)
    b3c = b3.reshape(C, 1).astype(jnp.float32)
    gamma_arr = jnp.reshape(gamma, (1, 1)).astype(jnp.float32)

    act_spec = pl.BlockSpec((NB, C, S), lambda b: (b, 0, 0))
    w_spec = pl.BlockSpec((9, C, C), lambda b: (0, 0, 0))
    bias_spec = pl.BlockSpec((C, 1), lambda b: (0, 0))
    gamma_spec = pl.BlockSpec(memory_space=pltpu.MemorySpace.SMEM)

    out = pl.pallas_call(
        functools.partial(_conv_block_kernel, H, W),
        out_shape=jax.ShapeDtypeStruct((N, C, S), jnp.float32),
        grid_spec=pltpu.PrefetchScalarGridSpec(
            num_scalar_prefetch=0,
            grid=(N // NB,),
            in_specs=[act_spec,
                      w_spec, bias_spec,               # conv1
                      w_spec, bias_spec,               # conv2
                      w_spec, bias_spec,               # conv3
                      gamma_spec],
            out_specs=act_spec),
        compiler_params=pltpu.CompilerParams(
            dimension_semantics=("parallel",)),
    )(x, w1m, b1c, w2m, b2c, w3m, b3c, gamma_arr)

    return out.reshape(N, C, H, W)


# ----------------------------------------------------------------------------
# Parameter setup: deterministic init + SpectralNorm (1 power iteration),
# mirroring the SAGAN SpectralNorm wrapper.  Plain-JAX parameter preprocessing.
# ----------------------------------------------------------------------------
def spectral_norm_weight(w, key, power_iterations=1, eps=1e-12):
    cout = w.shape[0]
    w_mat = w.reshape(cout, -1)
    u = jax.random.normal(key, (cout,), dtype=jnp.float32)
    u = u / (jnp.linalg.norm(u) + eps)
    v = None
    for _ in range(power_iterations):
        v = w_mat.T @ u
        v = v / (jnp.linalg.norm(v) + eps)
        u = w_mat @ v
        u = u / (jnp.linalg.norm(u) + eps)
    sigma = u @ (w_mat @ v)
    return w / sigma


def init_conv_block_params(in_dim, key):
    keys = jax.random.split(key, 7)
    fan_in = in_dim * 3 * 3
    bound = 1.0 / jnp.sqrt(fan_in)
    params = []
    for i in range(3):
        w = jax.random.uniform(keys[2 * i], (in_dim, in_dim, 3, 3),
                               minval=-bound, maxval=bound, dtype=jnp.float32)
        b = jax.random.uniform(keys[2 * i + 1], (in_dim,),
                               minval=-bound, maxval=bound, dtype=jnp.float32)
        w_sn = spectral_norm_weight(w, jax.random.fold_in(keys[6], i))
        params.append((w_sn, b))
    gamma = jnp.zeros((1,), jnp.float32)            # nn.Parameter(torch.zeros(1))
    return params, gamma


# ----------------------------------------------------------------------------
# Pure-JAX reference.  matmul_dtype lets us build a bf16-operand reference
# matching the kernel's MXU precision.
# ----------------------------------------------------------------------------
def ref_forward(x_nchw, w1, b1, w2, b2, w3, b3, gamma, matmul_dtype=jnp.float32):
    def leaky(v):
        return jnp.where(v > 0, v, 0.1 * v)

    def conv(x, w, b):
        xp = jnp.pad(x, ((0, 0), (0, 0), (1, 1), (1, 1)), mode='reflect')
        y = jax.lax.conv_general_dilated(
            xp.astype(matmul_dtype), w.astype(matmul_dtype),
            window_strides=(1, 1), padding='VALID',
            dimension_numbers=('NCHW', 'OIHW', 'NCHW'),
            preferred_element_type=jnp.float32)
        return y + b[None, :, None, None]

    out = leaky(conv(x_nchw, w1, b1))
    out = leaky(conv(out, w2, b2))
    out = conv(out, w3, b3)
    return gamma.reshape(()) * out + x_nchw


if __name__ == "__main__":
    key = jax.random.PRNGKey(0)
    k_x, k_p = jax.random.split(key)

    N, C, H, W = 2, 4, 16, 16
    x = jax.random.normal(k_x, (N, C, H, W), dtype=jnp.float32)

    (p1, p2, p3), gamma = init_conv_block_params(C, k_p)
    (w1, b1), (w2, b2), (w3, b3) = p1, p2, p3

    # Module-faithful run (gamma == 0 as in __init__): output must equal x.
    out = jax.block_until_ready(
        conv_block_forward(x, w1, b1, w2, b2, w3, b3, gamma))
    assert out.shape == (N, C, H, W)
    assert jnp.allclose(out, x, atol=1e-6, rtol=0.0)

    # Non-zero gamma so the conv path is actually exercised.
    gamma_nz = jnp.full((1,), 0.7, jnp.float32)
    out_nz = jax.block_until_ready(
        conv_block_forward(x, w1, b1, w2, b2, w3, b3, gamma_nz))

    # Check vs. a reference using the same bf16 MXU operands / f32 accumulation.
    ref_bf16 = ref_forward(x, w1, b1, w2, b2, w3, b3, gamma_nz,
                           matmul_dtype=jnp.bfloat16)
    assert jnp.allclose(out_nz, ref_bf16, atol=1e-2, rtol=1e-2)

    # Loose check vs. the full-f32 reference (bf16 operands in the kernel).
    ref_f32 = ref_forward(x, w1, b1, w2, b2, w3, b3, gamma_nz,
                          matmul_dtype=jnp.float32)
    assert jnp.allclose(out_nz, ref_f32, atol=5e-2, rtol=5e-2)

    # batch_block=N folds the whole batch into one grid step (v5e/v6e path);
    # it must match the default (v7x-friendly) two-parallel-step result.
    out_nz_fold = jax.block_until_ready(
        conv_block_forward(x, w1, b1, w2, b2, w3, b3, gamma_nz, batch_block=N))
    assert jnp.allclose(out_nz, out_nz_fold, atol=1e-6, rtol=0.0)

    print("KERNEL_OK")
</pallas_src>

<mosaic_0001>
module attributes {stable_mosaic.version = 11 : i64} {
  func.func @_conv_block_kernel(%arg0: i32, %arg1: memref<1x4x256xf32, #tpu.memory_space<vmem>>, %arg2: memref<9x4x4xbf16, #tpu.memory_space<vmem>>, %arg3: memref<4x1xf32, #tpu.memory_space<vmem>>, %arg4: memref<9x4x4xbf16, #tpu.memory_space<vmem>>, %arg5: memref<4x1xf32, #tpu.memory_space<vmem>>, %arg6: memref<9x4x4xbf16, #tpu.memory_space<vmem>>, %arg7: memref<4x1xf32, #tpu.memory_space<vmem>>, %arg8: memref<1x1xf32, #tpu.memory_space<smem>>, %arg9: memref<1x4x256xf32, #tpu.memory_space<vmem>>) attributes {dimension_semantics = [#tpu.dimension_semantics<parallel>], iteration_bounds = array<i64: 2>, scalar_prefetch = 0 : i64, scratch_operands = 0 : i64, tpu.core_type = #tpu.core_type<tc>, window_params = [{transform_indices = @transform_0, window_bounds = array<i64: 1, 4, 256>}, {pipeline_mode = #tpu.pipeline_mode<synchronous>, transform_indices = @transform_1, window_bounds = array<i64: 9, 4, 4>}, {pipeline_mode = #tpu.pipeline_mode<synchronous>, transform_indices = @transform_2, window_bounds = array<i64: 4, 1>}, {pipeline_mode = #tpu.pipeline_mode<synchronous>, transform_indices = @transform_3, window_bounds = array<i64: 9, 4, 4>}, {pipeline_mode = #tpu.pipeline_mode<synchronous>, transform_indices = @transform_4, window_bounds = array<i64: 4, 1>}, {pipeline_mode = #tpu.pipeline_mode<synchronous>, transform_indices = @transform_5, window_bounds = array<i64: 9, 4, 4>}, {pipeline_mode = #tpu.pipeline_mode<synchronous>, transform_indices = @transform_6, window_bounds = array<i64: 4, 1>}, {transform_indices = @transform_7, window_bounds = array<i64: 1, 1>}, {transform_indices = @transform_8, window_bounds = array<i64: 1, 4, 256>}]} {
    %0 = tpu.iota {dimensions = array<i32: 1>} : vector<4x256xi32>
    %c15_i32 = arith.constant 15 : i32
    %1 = vector.broadcast %c15_i32 : i32 to vector<4x256xi32>
    %2 = arith.andi %0, %1 : vector<4x256xi32>
    %c4_i32 = arith.constant 4 : i32
    %3 = vector.broadcast %c4_i32 : i32 to vector<4x256xi32>
    %4 = arith.shrsi %0, %3 : vector<4x256xi32>
    %c0_i32 = arith.constant 0 : i32
    %5 = vector.broadcast %c0_i32 : i32 to vector<4x256xi32>
    %6 = arith.cmpi eq, %2, %5 : vector<4x256xi32>
    %c15_i32_0 = arith.constant 15 : i32
    %7 = vector.broadcast %c15_i32_0 : i32 to vector<4x256xi32>
    %8 = arith.cmpi eq, %2, %7 : vector<4x256xi32>
    %c0_i32_1 = arith.constant 0 : i32
    %9 = vector.broadcast %c0_i32_1 : i32 to vector<4x256xi32>
    %10 = arith.cmpi eq, %4, %9 : vector<4x256xi32>
    %c15_i32_2 = arith.constant 15 : i32
    %11 = vector.broadcast %c15_i32_2 : i32 to vector<4x256xi32>
    %12 = arith.cmpi eq, %4, %11 : vector<4x256xi32>
    %c0 = arith.constant 0 : index
    %c0_3 = arith.constant 0 : index
    %13 = memref.load %arg8[%c0, %c0_3] : memref<1x1xf32, #tpu.memory_space<smem>>
    %c0_4 = arith.constant 0 : index
    %c0_5 = arith.constant 0 : index
    %c0_6 = arith.constant 0 : index
    %14 = vector.load %arg1[%c0_4, %c0_5, %c0_6] : memref<1x4x256xf32, #tpu.memory_space<vmem>>, vector<1x4x256xf32>
    %15 = vector.shape_cast %14 : vector<1x4x256xf32> to vector<4x256xf32>
    %c16_i32 = arith.constant 16 : i32
    %16 = tpu.dynamic_rotate %15 by %c16_i32 dim 1 : vector<4x256xf32>, i32 -> vector<4x256xf32>
    %c240_i32 = arith.constant 240 : i32
    %17 = tpu.dynamic_rotate %15 by %c240_i32 dim 1 : vector<4x256xf32>, i32 -> vector<4x256xf32>
    %18 = arith.select %10, %17, %16 : vector<4x256xi1>, vector<4x256xf32>
    %c1_i32 = arith.constant 1 : i32
    %19 = tpu.dynamic_rotate %18 by %c1_i32 dim 1 : vector<4x256xf32>, i32 -> vector<4x256xf32>
    %c255_i32 = arith.constant 255 : i32
    %20 = tpu.dynamic_rotate %18 by %c255_i32 dim 1 : vector<4x256xf32>, i32 -> vector<4x256xf32>
    %21 = arith.select %6, %20, %19 : vector<4x256xi1>, vector<4x256xf32>
    %22 = arith.truncf %21 : vector<4x256xf32> to vector<4x256xbf16>
    %c0_7 = arith.constant 0 : index
    %c0_8 = arith.constant 0 : index
    %c0_9 = arith.constant 0 : index
    %23 = vector.load %arg2[%c0_7, %c0_8, %c0_9] : memref<9x4x4xbf16, #tpu.memory_space<vmem>>, vector<1x4x4xbf16>
    %24 = vector.shape_cast %23 : vector<1x4x4xbf16> to vector<4x4xbf16>
    %cst = arith.constant dense<0.000000e+00> : vector<4x256xf32>
    %25 = tpu.matmul %24, %22, %cst {dimension_numbers = #tpu.dot_dimension_numbers<[1], [0], [0], [1], [0, 0, 1, 1], [], []>} : vector<4x4xbf16>, vector<4x256xbf16>, vector<4x256xf32> -> vector<4x256xf32>
    %26 = arith.truncf %18 : vector<4x256xf32> to vector<4x256xbf16>
    %c1 = arith.constant 1 : index
    %c0_10 = arith.constant 0 : index
    %c0_11 = arith.constant 0 : index
    %27 = vector.load %arg2[%c1, %c0_10, %c0_11] : memref<9x4x4xbf16, #tpu.memory_space<vmem>>, vector<1x4x4xbf16>
    %28 = vector.shape_cast %27 : vector<1x4x4xbf16> to vector<4x4xbf16>
    %cst_12 = arith.constant dense<0.000000e+00> : vector<4x256xf32>
    %29 = tpu.matmul %28, %26, %cst_12 {dimension_numbers = #tpu.dot_dimension_numbers<[1], [0], [0], [1], [0, 0, 1, 1], [], []>} : vector<4x4xbf16>, vector<4x256xbf16>, vector<4x256xf32> -> vector<4x256xf32>
    %30 = arith.addf %25, %29 : vector<4x256xf32>
    %c255_i32_13 = arith.constant 255 : i32
    %31 = tpu.dynamic_rotate %18 by %c255_i32_13 dim 1 : vector<4x256xf32>, i32 -> vector<4x256xf32>
    %c1_i32_14 = arith.constant 1 : i32
    %32 = tpu.dynamic_rotate %18 by %c1_i32_14 dim 1 : vector<4x256xf32>, i32 -> vector<4x256xf32>
    %33 = arith.select %8, %32, %31 : vector<4x256xi1>, vector<4x256xf32>
    %34 = arith.truncf %33 : vector<4x256xf32> to vector<4x256xbf16>
    %c2 = arith.constant 2 : index
    %c0_15 = arith.constant 0 : index
    %c0_16 = arith.constant 0 : index
    %35 = vector.load %arg2[%c2, %c0_15, %c0_16] : memref<9x4x4xbf16, #tpu.memory_space<vmem>>, vector<1x4x4xbf16>
    %36 = vector.shape_cast %35 : vector<1x4x4xbf16> to vector<4x4xbf16>
    %cst_17 = arith.constant dense<0.000000e+00> : vector<4x256xf32>
    %37 = tpu.matmul %36, %34, %cst_17 {dimension_numbers = #tpu.dot_dimension_numbers<[1], [0], [0], [1], [0, 0, 1, 1], [], []>} : vector<4x4xbf16>, vector<4x256xbf16>, vector<4x256xf32> -> vector<4x256xf32>
    %38 = arith.addf %30, %37 : vector<4x256xf32>
    %c1_i32_18 = arith.constant 1 : i32
    %39 = tpu.dynamic_rotate %15 by %c1_i32_18 dim 1 : vector<4x256xf32>, i32 -> vector<4x256xf32>
    %c255_i32_19 = arith.constant 255 : i32
    %40 = tpu.dynamic_rotate %15 by %c255_i32_19 dim 1 : vector<4x256xf32>, i32 -> vector<4x256xf32>
    %41 = arith.select %6, %40, %39 : vector<4x256xi1>, vector<4x256xf32>
    %42 = arith.truncf %41 : vector<4x256xf32> to vector<4x256xbf16>
    %c3 = arith.constant 3 : index
    %c0_20 = arith.constant 0 : index
    %c0_21 = arith.constant 0 : index
    %43 = vector.load %arg2[%c3, %c0_20, %c0_21] : memref<9x4x4xbf16, #tpu.memory_space<vmem>>, vector<1x4x4xbf16>
    %44 = vector.shape_cast %43 : vector<1x4x4xbf16> to vector<4x4xbf16>
    %cst_22 = arith.constant dense<0.000000e+00> : vector<4x256xf32>
    %45 = tpu.matmul %44, %42, %cst_22 {dimension_numbers = #tpu.dot_dimension_numbers<[1], [0], [0], [1], [0, 0, 1, 1], [], []>} : vector<4x4xbf16>, vector<4x256xbf16>, vector<4x256xf32> -> vector<4x256xf32>
    %46 = arith.addf %38, %45 : vector<4x256xf32>
    %47 = arith.truncf %15 : vector<4x256xf32> to vector<4x256xbf16>
    %c4 = arith.constant 4 : index
    %c0_23 = arith.constant 0 : index
    %c0_24 = arith.constant 0 : index
    %48 = vector.load %arg2[%c4, %c0_23, %c0_24] : memref<9x4x4xbf16, #tpu.memory_space<vmem>>, vector<1x4x4xbf16>
    %49 = vector.shape_cast %48 : vector<1x4x4xbf16> to vector<4x4xbf16>
    %cst_25 = arith.constant dense<0.000000e+00> : vector<4x256xf32>
    %50 = tpu.matmul %49, %47, %cst_25 {dimension_numbers = #tpu.dot_dimension_numbers<[1], [0], [0], [1], [0, 0, 1, 1], [], []>} : vector<4x4xbf16>, vector<4x256xbf16>, vector<4x256xf32> -> vector<4x256xf32>
    %51 = arith.addf %46, %50 : vector<4x256xf32>
    %c255_i32_26 = arith.constant 255 : i32
    %52 = tpu.dynamic_rotate %15 by %c255_i32_26 dim 1 : vector<4x256xf32>, i32 -> vector<4x256xf32>
    %c1_i32_27 = arith.constant 1 : i32
    %53 = tpu.dynamic_rotate %15 by %c1_i32_27 dim 1 : vector<4x256xf32>, i32 -> vector<4x256xf32>
    %54 = arith.select %8, %53, %52 : vector<4x256xi1>, vector<4x256xf32>
    %55 = arith.truncf %54 : vector<4x256xf32> to vector<4x256xbf16>
    %c5 = arith.constant 5 : index
    %c0_28 = arith.constant 0 : index
    %c0_29 = arith.constant 0 : index
    %56 = vector.load %arg2[%c5, %c0_28, %c0_29] : memref<9x4x4xbf16, #tpu.memory_space<vmem>>, vector<1x4x4xbf16>
    %57 = vector.shape_cast %56 : vector<1x4x4xbf16> to vector<4x4xbf16>
    %cst_30 = arith.constant dense<0.000000e+00> : vector<4x256xf32>
    %58 = tpu.matmul %57, %55, %cst_30 {dimension_numbers = #tpu.dot_dimension_numbers<[1], [0], [0], [1], [0, 0, 1, 1], [], []>} : vector<4x4xbf16>, vector<4x256xbf16>, vector<4x256xf32> -> vector<4x256xf32>
    %59 = arith.addf %51, %58 : vector<4x256xf32>
    %c240_i32_31 = arith.constant 240 : i32
    %60 = tpu.dynamic_rotate %15 by %c240_i32_31 dim 1 : vector<4x256xf32>, i32 -> vector<4x256xf32>
    %c16_i32_32 = arith.constant 16 : i32
    %61 = tpu.dynamic_rotate %15 by %c16_i32_32 dim 1 : vector<4x256xf32>, i32 -> vector<4x256xf32>
    %62 = arith.select %12, %61, %60 : vector<4x256xi1>, vector<4x256xf32>
    %c1_i32_33 = arith.constant 1 : i32
    %63 = tpu.dynamic_rotate %62 by %c1_i32_33 dim 1 : vector<4x256xf32>, i32 -> vector<4x256xf32>
    %c255_i32_34 = arith.constant 255 : i32
    %64 = tpu.dynamic_rotate %62 by %c255_i32_34 dim 1 : vector<4x256xf32>, i32 -> vector<4x256xf32>
    %65 = arith.select %6, %64, %63 : vector<4x256xi1>, vector<4x256xf32>
    %66 = arith.truncf %65 : vector<4x256xf32> to vector<4x256xbf16>
    %c6 = arith.constant 6 : index
    %c0_35 = arith.constant 0 : index
    %c0_36 = arith.constant 0 : index
    %67 = vector.load %arg2[%c6, %c0_35, %c0_36] : memref<9x4x4xbf16, #tpu.memory_space<vmem>>, vector<1x4x4xbf16>
    %68 = vector.shape_cast %67 : vector<1x4x4xbf16> to vector<4x4xbf16>
    %cst_37 = arith.constant dense<0.000000e+00> : vector<4x256xf32>
    %69 = tpu.matmul %68, %66, %cst_37 {dimension_numbers = #tpu.dot_dimension_numbers<[1], [0], [0], [1], [0, 0, 1, 1], [], []>} : vector<4x4xbf16>, vector<4x256xbf16>, vector<4x256xf32> -> vector<4x256xf32>
    %70 = arith.addf %59, %69 : vector<4x256xf32>
    %71 = arith.truncf %62 : vector<4x256xf32> to vector<4x256xbf16>
    %c7 = arith.constant 7 : index
    %c0_38 = arith.constant 0 : index
    %c0_39 = arith.constant 0 : index
    %72 = vector.load %arg2[%c7, %c0_38, %c0_39] : memref<9x4x4xbf16, #tpu.memory_space<vmem>>, vector<1x4x4xbf16>
    %73 = vector.shape_cast %72 : vector<1x4x4xbf16> to vector<4x4xbf16>
    %cst_40 = arith.constant dense<0.000000e+00> : vector<4x256xf32>
    %74 = tpu.matmul %73, %71, %cst_40 {dimension_numbers = #tpu.dot_dimension_numbers<[1], [0], [0], [1], [0, 0, 1, 1], [], []>} : vector<4x4xbf16>, vector<4x256xbf16>, vector<4x256xf32> -> vector<4x256xf32>
    %75 = arith.addf %70, %74 : vector<4x256xf32>
    %c255_i32_41 = arith.constant 255 : i32
    %76 = tpu.dynamic_rotate %62 by %c255_i32_41 dim 1 : vector<4x256xf32>, i32 -> vector<4x256xf32>
    %c1_i32_42 = arith.constant 1 : i32
    %77 = tpu.dynamic_rotate %62 by %c1_i32_42 dim 1 : vector<4x256xf32>, i32 -> vector<4x256xf32>
    %78 = arith.select %8, %77, %76 : vector<4x256xi1>, vector<4x256xf32>
    %79 = arith.truncf %78 : vector<4x256xf32> to vector<4x256xbf16>
    %c8 = arith.constant 8 : index
    %c0_43 = arith.constant 0 : index
    %c0_44 = arith.constant 0 : index
    %80 = vector.load %arg2[%c8, %c0_43, %c0_44] : memref<9x4x4xbf16, #tpu.memory_space<vmem>>, vector<1x4x4xbf16>
    %81 = vector.shape_cast %80 : vector<1x4x4xbf16> to vector<4x4xbf16>
    %cst_45 = arith.constant dense<0.000000e+00> : vector<4x256xf32>
    %82 = tpu.matmul %81, %79, %cst_45 {dimension_numbers = #tpu.dot_dimension_numbers<[1], [0], [0], [1], [0, 0, 1, 1], [], []>} : vector<4x4xbf16>, vector<4x256xbf16>, vector<4x256xf32> -> vector<4x256xf32>
    %83 = arith.addf %75, %82 : vector<4x256xf32>
    %c0_46 = arith.constant 0 : index
    %c0_47 = arith.constant 0 : index
    %84 = vector.load %arg3[%c0_46, %c0_47] : memref<4x1xf32, #tpu.memory_space<vmem>>, vector<4x1xf32>
    %85 = vector.broadcast %84 : vector<4x1xf32> to vector<4x256xf32>
    %86 = arith.addf %83, %85 : vector<4x256xf32>
    %cst_48 = arith.constant 0.000000e+00 : f32
    %87 = vector.broadcast %cst_48 : f32 to vector<4x256xf32>
    %88 = arith.cmpf ogt, %86, %87 : vector<4x256xf32>
    %cst_49 = arith.constant 1.000000e-01 : f32
    %89 = vector.broadcast %cst_49 : f32 to vector<4x256xf32>
    %90 = arith.mulf %89, %86 : vector<4x256xf32>
    %91 = arith.select %88, %86, %90 : vector<4x256xi1>, vector<4x256xf32>
    %c16_i32_50 = arith.constant 16 : i32
    %92 = tpu.dynamic_rotate %91 by %c16_i32_50 dim 1 : vector<4x256xf32>, i32 -> vector<4x256xf32>
    %c240_i32_51 = arith.constant 240 : i32
    %93 = tpu.dynamic_rotate %91 by %c240_i32_51 dim 1 : vector<4x256xf32>, i32 -> vector<4x256xf32>
    %94 = arith.select %10, %93, %92 : vector<4x256xi1>, vector<4x256xf32>
    %c1_i32_52 = arith.constant 1 : i32
    %95 = tpu.dynamic_rotate %94 by %c1_i32_52 dim 1 : vector<4x256xf32>, i32 -> vector<4x256xf32>
    %c255_i32_53 = arith.constant 255 : i32
    %96 = tpu.dynamic_rotate %94 by %c255_i32_53 dim 1 : vector<4x256xf32>, i32 -> vector<4x256xf32>
    %97 = arith.select %6, %96, %95 : vector<4x256xi1>, vector<4x256xf32>
    %98 = arith.truncf %97 : vector<4x256xf32> to vector<4x256xbf16>
    %c0_54 = arith.constant 0 : index
    %c0_55 = arith.constant 0 : index
    %c0_56 = arith.constant 0 : index
    %99 = vector.load %arg4[%c0_54, %c0_55, %c0_56] : memref<9x4x4xbf16, #tpu.memory_space<vmem>>, vector<1x4x4xbf16>
    %100 = vector.shape_cast %99 : vector<1x4x4xbf16> to vector<4x4xbf16>
    %cst_57 = arith.constant dense<0.000000e+00> : vector<4x256xf32>
    %101 = tpu.matmul %100, %98, %cst_57 {dimension_numbers = #tpu.dot_dimension_numbers<[1], [0], [0], [1], [0, 0, 1, 1], [], []>} : vector<4x4xbf16>, vector<4x256xbf16>, vector<4x256xf32> -> vector<4x256xf32>
    %102 = arith.truncf %94 : vector<4x256xf32> to vector<4x256xbf16>
    %c1_58 = arith.constant 1 : index
    %c0_59 = arith.constant 0 : index
    %c0_60 = arith.constant 0 : index
    %103 = vector.load %arg4[%c1_58, %c0_59, %c0_60] : memref<9x4x4xbf16, #tpu.memory_space<vmem>>, vector<1x4x4xbf16>
    %104 = vector.shape_cast %103 : vector<1x4x4xbf16> to vector<4x4xbf16>
    %cst_61 = arith.constant dense<0.000000e+00> : vector<4x256xf32>
    %105 = tpu.matmul %104, %102, %cst_61 {dimension_numbers = #tpu.dot_dimension_numbers<[1], [0], [0], [1], [0, 0, 1, 1], [], []>} : vector<4x4xbf16>, vector<4x256xbf16>, vector<4x256xf32> -> vector<4x256xf32>
    %106 = arith.addf %101, %105 : vector<4x256xf32>
    %c255_i32_62 = arith.constant 255 : i32
    %107 = tpu.dynamic_rotate %94 by %c255_i32_62 dim 1 : vector<4x256xf32>, i32 -> vector<4x256xf32>
    %c1_i32_63 = arith.constant 1 : i32
    %108 = tpu.dynamic_rotate %94 by %c1_i32_63 dim 1 : vector<4x256xf32>, i32 -> vector<4x256xf32>
    %109 = arith.select %8, %108, %107 : vector<4x256xi1>, vector<4x256xf32>
    %110 = arith.truncf %109 : vector<4x256xf32> to vector<4x256xbf16>
    %c2_64 = arith.constant 2 : index
    %c0_65 = arith.constant 0 : index
    %c0_66 = arith.constant 0 : index
    %111 = vector.load %arg4[%c2_64, %c0_65, %c0_66] : memref<9x4x4xbf16, #tpu.memory_space<vmem>>, vector<1x4x4xbf16>
    %112 = vector.shape_cast %111 : vector<1x4x4xbf16> to vector<4x4xbf16>
    %cst_67 = arith.constant dense<0.000000e+00> : vector<4x256xf32>
    %113 = tpu.matmul %112, %110, %cst_67 {dimension_numbers = #tpu.dot_dimension_numbers<[1], [0], [0], [1], [0, 0, 1, 1], [], []>} : vector<4x4xbf16>, vector<4x256xbf16>, vector<4x256xf32> -> vector<4x256xf32>
    %114 = arith.addf %106, %113 : vector<4x256xf32>
    %c1_i32_68 = arith.constant 1 : i32
    %115 = tpu.dynamic_rotate %91 by %c1_i32_68 dim 1 : vector<4x256xf32>, i32 -> vector<4x256xf32>
    %c255_i32_69 = arith.constant 255 : i32
    %116 = tpu.dynamic_rotate %91 by %c255_i32_69 dim 1 : vector<4x256xf32>, i32 -> vector<4x256xf32>
    %117 = arith.select %6, %116, %115 : vector<4x256xi1>, vector<4x256xf32>
    %118 = arith.truncf %117 : vector<4x256xf32> to vector<4x256xbf16>
    %c3_70 = arith.constant 3 : index
    %c0_71 = arith.constant 0 : index
    %c0_72 = arith.constant 0 : index
    %119 = vector.load %arg4[%c3_70, %c0_71, %c0_72] : memref<9x4x4xbf16, #tpu.memory_space<vmem>>, vector<1x4x4xbf16>
    %120 = vector.shape_cast %119 : vector<1x4x4xbf16> to vector<4x4xbf16>
    %cst_73 = arith.constant dense<0.000000e+00> : vector<4x256xf32>
    %121 = tpu.matmul %120, %118, %cst_73 {dimension_numbers = #tpu.dot_dimension_numbers<[1], [0], [0], [1], [0, 0, 1, 1], [], []>} : vector<4x4xbf16>, vector<4x256xbf16>, vector<4x256xf32> -> vector<4x256xf32>
    %122 = arith.addf %114, %121 : vector<4x256xf32>
    %123 = arith.truncf %91 : vector<4x256xf32> to vector<4x256xbf16>
    %c4_74 = arith.constant 4 : index
    %c0_75 = arith.constant 0 : index
    %c0_76 = arith.constant 0 : index
    %124 = vector.load %arg4[%c4_74, %c0_75, %c0_76] : memref<9x4x4xbf16, #tpu.memory_space<vmem>>, vector<1x4x4xbf16>
    %125 = vector.shape_cast %124 : vector<1x4x4xbf16> to vector<4x4xbf16>
    %cst_77 = arith.constant dense<0.000000e+00> : vector<4x256xf32>
    %126 = tpu.matmul %125, %123, %cst_77 {dimension_numbers = #tpu.dot_dimension_numbers<[1], [0], [0], [1], [0, 0, 1, 1], [], []>} : vector<4x4xbf16>, vector<4x256xbf16>, vector<4x256xf32> -> vector<4x256xf32>
    %127 = arith.addf %122, %126 : vector<4x256xf32>
    %c255_i32_78 = arith.constant 255 : i32
    %128 = tpu.dynamic_rotate %91 by %c255_i32_78 dim 1 : vector<4x256xf32>, i32 -> vector<4x256xf32>
    %c1_i32_79 = arith.constant 1 : i32
    %129 = tpu.dynamic_rotate %91 by %c1_i32_79 dim 1 : vector<4x256xf32>, i32 -> vector<4x256xf32>
    %130 = arith.select %8, %129, %128 : vector<4x256xi1>, vector<4x256xf32>
    %131 = arith.truncf %130 : vector<4x256xf32> to vector<4x256xbf16>
    %c5_80 = arith.constant 5 : index
    %c0_81 = arith.constant 0 : index
    %c0_82 = arith.constant 0 : index
    %132 = vector.load %arg4[%c5_80, %c0_81, %c0_82] : memref<9x4x4xbf16, #tpu.memory_space<vmem>>, vector<1x4x4xbf16>
    %133 = vector.shape_cast %132 : vector<1x4x4xbf16> to vector<4x4xbf16>
    %cst_83 = arith.constant dense<0.000000e+00> : vector<4x256xf32>
    %134 = tpu.matmul %133, %131, %cst_83 {dimension_numbers = #tpu.dot_dimension_numbers<[1], [0], [0], [1], [0, 0, 1, 1], [], []>} : vector<4x4xbf16>, vector<4x256xbf16>, vector<4x256xf32> -> vector<4x256xf32>
    %135 = arith.addf %127, %134 : vector<4x256xf32>
    %c240_i32_84 = arith.constant 240 : i32
    %136 = tpu.dynamic_rotate %91 by %c240_i32_84 dim 1 : vector<4x256xf32>, i32 -> vector<4x256xf32>
    %c16_i32_85 = arith.constant 16 : i32
    %137 = tpu.dynamic_rotate %91 by %c16_i32_85 dim 1 : vector<4x256xf32>, i32 -> vector<4x256xf32>
    %138 = arith.select %12, %137, %136 : vector<4x256xi1>, vector<4x256xf32>
    %c1_i32_86 = arith.constant 1 : i32
    %139 = tpu.dynamic_rotate %138 by %c1_i32_86 dim 1 : vector<4x256xf32>, i32 -> vector<4x256xf32>
    %c255_i32_87 = arith.constant 255 : i32
    %140 = tpu.dynamic_rotate %138 by %c255_i32_87 dim 1 : vector<4x256xf32>, i32 -> vector<4x256xf32>
    %141 = arith.select %6, %140, %139 : vector<4x256xi1>, vector<4x256xf32>
    %142 = arith.truncf %141 : vector<4x256xf32> to vector<4x256xbf16>
    %c6_88 = arith.constant 6 : index
    %c0_89 = arith.constant 0 : index
    %c0_90 = arith.constant 0 : index
    %143 = vector.load %arg4[%c6_88, %c0_89, %c0_90] : memref<9x4x4xbf16, #tpu.memory_space<vmem>>, vector<1x4x4xbf16>
    %144 = vector.shape_cast %143 : vector<1x4x4xbf16> to vector<4x4xbf16>
    %cst_91 = arith.constant dense<0.000000e+00> : vector<4x256xf32>
    %145 = tpu.matmul %144, %142, %cst_91 {dimension_numbers = #tpu.dot_dimension_numbers<[1], [0], [0], [1], [0, 0, 1, 1], [], []>} : vector<4x4xbf16>, vector<4x256xbf16>, vector<4x256xf32> -> vector<4x256xf32>
    %146 = arith.addf %135, %145 : vector<4x256xf32>
    %147 = arith.truncf %138 : vector<4x256xf32> to vector<4x256xbf16>
    %c7_92 = arith.constant 7 : index
    %c0_93 = arith.constant 0 : index
    %c0_94 = arith.constant 0 : index
    %148 = vector.load %arg4[%c7_92, %c0_93, %c0_94] : memref<9x4x4xbf16, #tpu.memory_space<vmem>>, vector<1x4x4xbf16>
    %149 = vector.shape_cast %148 : vector<1x4x4xbf16> to vector<4x4xbf16>
    %cst_95 = arith.constant dense<0.000000e+00> : vector<4x256xf32>
    %150 = tpu.matmul %149, %147, %cst_95 {dimension_numbers = #tpu.dot_dimension_numbers<[1], [0], [0], [1], [0, 0, 1, 1], [], []>} : vector<4x4xbf16>, vector<4x256xbf16>, vector<4x256xf32> -> vector<4x256xf32>
    %151 = arith.addf %146, %150 : vector<4x256xf32>
    %c255_i32_96 = arith.constant 255 : i32
    %152 = tpu.dynamic_rotate %138 by %c255_i32_96 dim 1 : vector<4x256xf32>, i32 -> vector<4x256xf32>
    %c1_i32_97 = arith.constant 1 : i32
    %153 = tpu.dynamic_rotate %138 by %c1_i32_97 dim 1 : vector<4x256xf32>, i32 -> vector<4x256xf32>
    %154 = arith.select %8, %153, %152 : vector<4x256xi1>, vector<4x256xf32>
    %155 = arith.truncf %154 : vector<4x256xf32> to vector<4x256xbf16>
    %c8_98 = arith.constant 8 : index
    %c0_99 = arith.constant 0 : index
    %c0_100 = arith.constant 0 : index
    %156 = vector.load %arg4[%c8_98, %c0_99, %c0_100] : memref<9x4x4xbf16, #tpu.memory_space<vmem>>, vector<1x4x4xbf16>
    %157 = vector.shape_cast %156 : vector<1x4x4xbf16> to vector<4x4xbf16>
    %cst_101 = arith.constant dense<0.000000e+00> : vector<4x256xf32>
    %158 = tpu.matmul %157, %155, %cst_101 {dimension_numbers = #tpu.dot_dimension_numbers<[1], [0], [0], [1], [0, 0, 1, 1], [], []>} : vector<4x4xbf16>, vector<4x256xbf16>, vector<4x256xf32> -> vector<4x256xf32>
    %159 = arith.addf %151, %158 : vector<4x256xf32>
    %c0_102 = arith.constant 0 : index
    %c0_103 = arith.constant 0 : index
    %160 = vector.load %arg5[%c0_102, %c0_103] : memref<4x1xf32, #tpu.memory_space<vmem>>, vector<4x1xf32>
    %161 = vector.broadcast %160 : vector<4x1xf32> to vector<4x256xf32>
    %162 = arith.addf %159, %161 : vector<4x256xf32>
    %cst_104 = arith.constant 0.000000e+00 : f32
    %163 = vector.broadcast %cst_104 : f32 to vector<4x256xf32>
    %164 = arith.cmpf ogt, %162, %163 : vector<4x256xf32>
    %cst_105 = arith.constant 1.000000e-01 : f32
    %165 = vector.broadcast %cst_105 : f32 to vector<4x256xf32>
    %166 = arith.mulf %165, %162 : vector<4x256xf32>
    %167 = arith.select %164, %162, %166 : vector<4x256xi1>, vector<4x256xf32>
    %c16_i32_106 = arith.constant 16 : i32
    %168 = tpu.dynamic_rotate %167 by %c16_i32_106 dim 1 : vector<4x256xf32>, i32 -> vector<4x256xf32>
    %c240_i32_107 = arith.constant 240 : i32
    %169 = tpu.dynamic_rotate %167 by %c240_i32_107 dim 1 : vector<4x256xf32>, i32 -> vector<4x256xf32>
    %170 = arith.select %10, %169, %168 : vector<4x256xi1>, vector<4x256xf32>
    %c1_i32_108 = arith.constant 1 : i32
    %171 = tpu.dynamic_rotate %170 by %c1_i32_108 dim 1 : vector<4x256xf32>, i32 -> vector<4x256xf32>
    %c255_i32_109 = arith.constant 255 : i32
    %172 = tpu.dynamic_rotate %170 by %c255_i32_109 dim 1 : vector<4x256xf32>, i32 -> vector<4x256xf32>
    %173 = arith.select %6, %172, %171 : vector<4x256xi1>, vector<4x256xf32>
    %174 = arith.truncf %173 : vector<4x256xf32> to vector<4x256xbf16>
    %c0_110 = arith.constant 0 : index
    %c0_111 = arith.constant 0 : index
    %c0_112 = arith.constant 0 : index
    %175 = vector.load %arg6[%c0_110, %c0_111, %c0_112] : memref<9x4x4xbf16, #tpu.memory_space<vmem>>, vector<1x4x4xbf16>
    %176 = vector.shape_cast %175 : vector<1x4x4xbf16> to vector<4x4xbf16>
    %cst_113 = arith.constant dense<0.000000e+00> : vector<4x256xf32>
    %177 = tpu.matmul %176, %174, %cst_113 {dimension_numbers = #tpu.dot_dimension_numbers<[1], [0], [0], [1], [0, 0, 1, 1], [], []>} : vector<4x4xbf16>, vector<4x256xbf16>, vector<4x256xf32> -> vector<4x256xf32>
    %178 = arith.truncf %170 : vector<4x256xf32> to vector<4x256xbf16>
    %c1_114 = arith.constant 1 : index
    %c0_115 = arith.constant 0 : index
    %c0_116 = arith.constant 0 : index
    %179 = vector.load %arg6[%c1_114, %c0_115, %c0_116] : memref<9x4x4xbf16, #tpu.memory_space<vmem>>, vector<1x4x4xbf16>
    %180 = vector.shape_cast %179 : vector<1x4x4xbf16> to vector<4x4xbf16>
    %cst_117 = arith.constant dense<0.000000e+00> : vector<4x256xf32>
    %181 = tpu.matmul %180, %178, %cst_117 {dimension_numbers = #tpu.dot_dimension_numbers<[1], [0], [0], [1], [0, 0, 1, 1], [], []>} : vector<4x4xbf16>, vector<4x256xbf16>, vector<4x256xf32> -> vector<4x256xf32>
    %182 = arith.addf %177, %181 : vector<4x256xf32>
    %c255_i32_118 = arith.constant 255 : i32
    %183 = tpu.dynamic_rotate %170 by %c255_i32_118 dim 1 : vector<4x256xf32>, i32 -> vector<4x256xf32>
    %c1_i32_119 = arith.constant 1 : i32
    %184 = tpu.dynamic_rotate %170 by %c1_i32_119 dim 1 : vector<4x256xf32>, i32 -> vector<4x256xf32>
    %185 = arith.select %8, %184, %183 : vector<4x256xi1>, vector<4x256xf32>
    %186 = arith.truncf %185 : vector<4x256xf32> to vector<4x256xbf16>
    %c2_120 = arith.constant 2 : index
    %c0_121 = arith.constant 0 : index
    %c0_122 = arith.constant 0 : index
    %187 = vector.load %arg6[%c2_120, %c0_121, %c0_122] : memref<9x4x4xbf16, #tpu.memory_space<vmem>>, vector<1x4x4xbf16>
    %188 = vector.shape_cast %187 : vector<1x4x4xbf16> to vector<4x4xbf16>
    %cst_123 = arith.constant dense<0.000000e+00> : vector<4x256xf32>
    %189 = tpu.matmul %188, %186, %cst_123 {dimension_numbers = #tpu.dot_dimension_numbers<[1], [0], [0], [1], [0, 0, 1, 1], [], []>} : vector<4x4xbf16>, vector<4x256xbf16>, vector<4x256xf32> -> vector<4x256xf32>
    %190 = arith.addf %182, %189 : vector<4x256xf32>
    %c1_i32_124 = arith.constant 1 : i32
    %191 = tpu.dynamic_rotate %167 by %c1_i32_124 dim 1 : vector<4x256xf32>, i32 -> vector<4x256xf32>
    %c255_i32_125 = arith.constant 255 : i32
    %192 = tpu.dynamic_rotate %167 by %c255_i32_125 dim 1 : vector<4x256xf32>, i32 -> vector<4x256xf32>
    %193 = arith.select %6, %192, %191 : vector<4x256xi1>, vector<4x256xf32>
    %194 = arith.truncf %193 : vector<4x256xf32> to vector<4x256xbf16>
    %c3_126 = arith.constant 3 : index
    %c0_127 = arith.constant 0 : index
    %c0_128 = arith.constant 0 : index
    %195 = vector.load %arg6[%c3_126, %c0_127, %c0_128] : memref<9x4x4xbf16, #tpu.memory_space<vmem>>, vector<1x4x4xbf16>
    %196 = vector.shape_cast %195 : vector<1x4x4xbf16> to vector<4x4xbf16>
    %cst_129 = arith.constant dense<0.000000e+00> : vector<4x256xf32>
    %197 = tpu.matmul %196, %194, %cst_129 {dimension_numbers = #tpu.dot_dimension_numbers<[1], [0], [0], [1], [0, 0, 1, 1], [], []>} : vector<4x4xbf16>, vector<4x256xbf16>, vector<4x256xf32> -> vector<4x256xf32>
    %198 = arith.addf %190, %197 : vector<4x256xf32>
    %199 = arith.truncf %167 : vector<4x256xf32> to vector<4x256xbf16>
    %c4_130 = arith.constant 4 : index
    %c0_131 = arith.constant 0 : index
    %c0_132 = arith.constant 0 : index
    %200 = vector.load %arg6[%c4_130, %c0_131, %c0_132] : memref<9x4x4xbf16, #tpu.memory_space<vmem>>, vector<1x4x4xbf16>
    %201 = vector.shape_cast %200 : vector<1x4x4xbf16> to vector<4x4xbf16>
    %cst_133 = arith.constant dense<0.000000e+00> : vector<4x256xf32>
    %202 = tpu.matmul %201, %199, %cst_133 {dimension_numbers = #tpu.dot_dimension_numbers<[1], [0], [0], [1], [0, 0, 1, 1], [], []>} : vector<4x4xbf16>, vector<4x256xbf16>, vector<4x256xf32> -> vector<4x256xf32>
    %203 = arith.addf %198, %202 : vector<4x256xf32>
    %c255_i32_134 = arith.constant 255 : i32
    %204 = tpu.dynamic_rotate %167 by %c255_i32_134 dim 1 : vector<4x256xf32>, i32 -> vector<4x256xf32>
    %c1_i32_135 = arith.constant 1 : i32
    %205 = tpu.dynamic_rotate %167 by %c1_i32_135 dim 1 : vector<4x256xf32>, i32 -> vector<4x256xf32>
    %206 = arith.select %8, %205, %204 : vector<4x256xi1>, vector<4x256xf32>
    %207 = arith.truncf %206 : vector<4x256xf32> to vector<4x256xbf16>
    %c5_136 = arith.constant 5 : index
    %c0_137 = arith.constant 0 : index
    %c0_138 = arith.constant 0 : index
    %208 = vector.load %arg6[%c5_136, %c0_137, %c0_138] : memref<9x4x4xbf16, #tpu.memory_space<vmem>>, vector<1x4x4xbf16>
    %209 = vector.shape_cast %208 : vector<1x4x4xbf16> to vector<4x4xbf16>
    %cst_139 = arith.constant dense<0.000000e+00> : vector<4x256xf32>
    %210 = tpu.matmul %209, %207, %cst_139 {dimension_numbers = #tpu.dot_dimension_numbers<[1], [0], [0], [1], [0, 0, 1, 1], [], []>} : vector<4x4xbf16>, vector<4x256xbf16>, vector<4x256xf32> -> vector<4x256xf32>
    %211 = arith.addf %203, %210 : vector<4x256xf32>
    %c240_i32_140 = arith.constant 240 : i32
    %212 = tpu.dynamic_rotate %167 by %c240_i32_140 dim 1 : vector<4x256xf32>, i32 -> vector<4x256xf32>
    %c16_i32_141 = arith.constant 16 : i32
    %213 = tpu.dynamic_rotate %167 by %c16_i32_141 dim 1 : vector<4x256xf32>, i32 -> vector<4x256xf32>
    %214 = arith.select %12, %213, %212 : vector<4x256xi1>, vector<4x256xf32>
    %c1_i32_142 = arith.constant 1 : i32
    %215 = tpu.dynamic_rotate %214 by %c1_i32_142 dim 1 : vector<4x256xf32>, i32 -> vector<4x256xf32>
    %c255_i32_143 = arith.constant 255 : i32
    %216 = tpu.dynamic_rotate %214 by %c255_i32_143 dim 1 : vector<4x256xf32>, i32 -> vector<4x256xf32>
    %217 = arith.select %6, %216, %215 : vector<4x256xi1>, vector<4x256xf32>
    %218 = arith.truncf %217 : vector<4x256xf32> to vector<4x256xbf16>
    %c6_144 = arith.constant 6 : index
    %c0_145 = arith.constant 0 : index
    %c0_146 = arith.constant 0 : index
    %219 = vector.load %arg6[%c6_144, %c0_145, %c0_146] : memref<9x4x4xbf16, #tpu.memory_space<vmem>>, vector<1x4x4xbf16>
    %220 = vector.shape_cast %219 : vector<1x4x4xbf16> to vector<4x4xbf16>
    %cst_147 = arith.constant dense<0.000000e+00> : vector<4x256xf32>
    %221 = tpu.matmul %220, %218, %cst_147 {dimension_numbers = #tpu.dot_dimension_numbers<[1], [0], [0], [1], [0, 0, 1, 1], [], []>} : vector<4x4xbf16>, vector<4x256xbf16>, vector<4x256xf32> -> vector<4x256xf32>
    %222 = arith.addf %211, %221 : vector<4x256xf32>
    %223 = arith.truncf %214 : vector<4x256xf32> to vector<4x256xbf16>
    %c7_148 = arith.constant 7 : index
    %c0_149 = arith.constant 0 : index
    %c0_150 = arith.constant 0 : index
    %224 = vector.load %arg6[%c7_148, %c0_149, %c0_150] : memref<9x4x4xbf16, #tpu.memory_space<vmem>>, vector<1x4x4xbf16>
    %225 = vector.shape_cast %224 : vector<1x4x4xbf16> to vector<4x4xbf16>
    %cst_151 = arith.constant dense<0.000000e+00> : vector<4x256xf32>
    %226 = tpu.matmul %225, %223, %cst_151 {dimension_numbers = #tpu.dot_dimension_numbers<[1], [0], [0], [1], [0, 0, 1, 1], [], []>} : vector<4x4xbf16>, vector<4x256xbf16>, vector<4x256xf32> -> vector<4x256xf32>
    %227 = arith.addf %222, %226 : vector<4x256xf32>
    %c255_i32_152 = arith.constant 255 : i32
    %228 = tpu.dynamic_rotate %214 by %c255_i32_152 dim 1 : vector<4x256xf32>, i32 -> vector<4x256xf32>
    %c1_i32_153 = arith.constant 1 : i32
    %229 = tpu.dynamic_rotate %214 by %c1_i32_153 dim 1 : vector<4x256xf32>, i32 -> vector<4x256xf32>
    %230 = arith.select %8, %229, %228 : vector<4x256xi1>, vector<4x256xf32>
    %231 = arith.truncf %230 : vector<4x256xf32> to vector<4x256xbf16>
    %c8_154 = arith.constant 8 : index
    %c0_155 = arith.constant 0 : index
    %c0_156 = arith.constant 0 : index
    %232 = vector.load %arg6[%c8_154, %c0_155, %c0_156] : memref<9x4x4xbf16, #tpu.memory_space<vmem>>, vector<1x4x4xbf16>
    %233 = vector.shape_cast %232 : vector<1x4x4xbf16> to vector<4x4xbf16>
    %cst_157 = arith.constant dense<0.000000e+00> : vector<4x256xf32>
    %234 = tpu.matmul %233, %231, %cst_157 {dimension_numbers = #tpu.dot_dimension_numbers<[1], [0], [0], [1], [0, 0, 1, 1], [], []>} : vector<4x4xbf16>, vector<4x256xbf16>, vector<4x256xf32> -> vector<4x256xf32>
    %235 = arith.addf %227, %234 : vector<4x256xf32>
    %c0_158 = arith.constant 0 : index
    %c0_159 = arith.constant 0 : index
    %236 = vector.load %arg7[%c0_158, %c0_159] : memref<4x1xf32, #tpu.memory_space<vmem>>, vector<4x1xf32>
    %237 = vector.broadcast %236 : vector<4x1xf32> to vector<4x256xf32>
    %238 = arith.addf %235, %237 : vector<4x256xf32>
    %239 = vector.broadcast %13 : f32 to vector<4x256xf32>
    %240 = arith.mulf %239, %238 : vector<4x256xf32>
    %241 = arith.addf %240, %15 : vector<4x256xf32>
    %c0_160 = arith.constant 0 : index
    %c0_161 = arith.constant 0 : index
    %c0_162 = arith.constant 0 : index
    %242 = vector.load %arg9[%c0_160, %c0_161, %c0_162] : memref<1x4x256xf32, #tpu.memory_space<vmem>>, vector<1x4x256xf32>
    %243 = vector.shape_cast %242 : vector<1x4x256xf32> to vector<4x256xf32>
    %244 = vector.shape_cast %241 : vector<4x256xf32> to vector<1x4x256xf32>
    tpu.vector_store %arg9[%c0_160, %c0_161, %c0_162], %244 {strides = array<i32>} : memref<1x4x256xf32, #tpu.memory_space<vmem>>, vector<1x4x256xf32>,
    return
  }
  func.func @transform_0(%arg0: i32) -> (i32, i32, i32) {
    %c0_i32 = arith.constant 0 : i32
    %c0_i32_0 = arith.constant 0 : i32
    %c0_i32_1 = arith.constant 0 : i32
    return %arg0, %c0_i32, %c0_i32_0 : i32, i32, i32
  }
  func.func @transform_1(%arg0: i32) -> (i32, i32, i32) {
    %c0_i32 = arith.constant 0 : i32
    %c0_i32_0 = arith.constant 0 : i32
    %c0_i32_1 = arith.constant 0 : i32
    %c0_i32_2 = arith.constant 0 : i32
    return %c0_i32, %c0_i32_0, %c0_i32_1 : i32, i32, i32
  }
  func.func @transform_2(%arg0: i32) -> (i32, i32) {
    %c0_i32 = arith.constant 0 : i32
    %c0_i32_0 = arith.constant 0 : i32
    %c0_i32_1 = arith.constant 0 : i32
    return %c0_i32, %c0_i32_0 : i32, i32
  }
  func.func @transform_3(%arg0: i32) -> (i32, i32, i32) {
    %c0_i32 = arith.constant 0 : i32
    %c0_i32_0 = arith.constant 0 : i32
    %c0_i32_1 = arith.constant 0 : i32
    %c0_i32_2 = arith.constant 0 : i32
    return %c0_i32, %c0_i32_0, %c0_i32_1 : i32, i32, i32
  }
  func.func @transform_4(%arg0: i32) -> (i32, i32) {
    %c0_i32 = arith.constant 0 : i32
    %c0_i32_0 = arith.constant 0 : i32
    %c0_i32_1 = arith.constant 0 : i32
    return %c0_i32, %c0_i32_0 : i32, i32
  }
  func.func @transform_5(%arg0: i32) -> (i32, i32, i32) {
    %c0_i32 = arith.constant 0 : i32
    %c0_i32_0 = arith.constant 0 : i32
    %c0_i32_1 = arith.constant 0 : i32
    %c0_i32_2 = arith.constant 0 : i32
    return %c0_i32, %c0_i32_0, %c0_i32_1 : i32, i32, i32
  }
  func.func @transform_6(%arg0: i32) -> (i32, i32) {
    %c0_i32 = arith.constant 0 : i32
    %c0_i32_0 = arith.constant 0 : i32
    %c0_i32_1 = arith.constant 0 : i32
    return %c0_i32, %c0_i32_0 : i32, i32
  }
  func.func @transform_7(%arg0: i32) -> (i32, i32) {
    %c0_i32 = arith.constant 0 : i32
    %c0_i32_0 = arith.constant 0 : i32
    %c0_i32_1 = arith.constant 0 : i32
    return %c0_i32, %c0_i32_0 : i32, i32
  }
  func.func @transform_8(%arg0: i32) -> (i32, i32, i32) {
    %c0_i32 = arith.constant 0 : i32
    %c0_i32_0 = arith.constant 0 : i32
    %c0_i32_1 = arith.constant 0 : i32
    return %arg0, %c0_i32, %c0_i32_0 : i32, i32, i32
  }
}

</mosaic_0001>

<bundles_post_ra>
// kernel: conv_block_forward.1
= control target key start
LH: loop header
LB: loop body
LE: loop exit
PB: predicated region body
PF: predicated region fallthrough
CT: control target
= control target key end

     0   :  { %s2036_s29 = smov 0   ;;  %s2585_s0 = inlined_call_operand.vmem [shape: f32[2,4,256], index: 0, kind: input, shape index: {}]   ;;  %s2586_s1 = inlined_call_operand.vmem [shape: bf16[9,4,4], index: 1, kind: input, shape index: {}]   ;;  %s2587_s2 = inlined_call_operand.vmem [shape: f32[4,1], index: 2, kind: input, shape index: {}]   ;;  %s2588_s3 = inlined_call_operand.vmem [shape: bf16[9,4,4], index: 3, kind: input, shape index: {}]   ;;  %s2589_s4 = inlined_call_operand.vmem [shape: f32[4,1], index: 4, kind: input, shape index: {}]   ;;  %s2590_s5 = inlined_call_operand.vmem [shape: bf16[9,4,4], index: 5, kind: input, shape index: {}]   ;;  %s2591_s6 = inlined_call_operand.vmem [shape: f32[4,1], index: 6, kind: input, shape index: {}]   ;;  %s2592_s7 = inlined_call_operand.<no memory space> [shape: f32[1,1], index: 7, kind: input, shape index: {}]   ;;  %s2593_s8 = inlined_call_operand.vmem [shape: f32[2,4,256], index: 8, kind: output, shape index: {}]  }
   0x1   :  { %13 = sst [smem:[#allocation2]] %s2592_s7 }
   0x2 LB: > { %s1749_s30 = sadd.s32 4294967295, %s1981_s29   ;;  %p1753_p0 = scmp.ge.s32.totalorder %s1981_s29, 1  ;;  %s1981_s29 = sphi %s2036_s29, %s19_s29  }
   0x3   : > { %p263_p1 = scmp.lt.s32.totalorder %s1981_s29, 3 }
   0x5   : > { %p264_p2 = pnand %p1753_p0, %p263_p1 }
   0x6   : > { %p297_p3 = scmp.lt.s32.totalorder (!%p264_p2), %s1749_s30, 1  ;;  %s1983_s12 = smov (!%p264_p2), 16  }
   0x7   : > { %267 = sbr.rel (%p264_p2) target bundleno = 1357 (0x54d), region = 52  ;;  %s1984_s13 = smov (!%p264_p2), 112  }
   0x8   : > { %s1985_s14 = smov (!%p264_p2), 1   ;;  %s1986_s15 = smov (!%p264_p2), 127  }
   0xc   : > { %s2611_s30 = smov (!%p297_p3, %s1749_s30), 1  ;;  %v308_v7 = vlaneseq  ;;  %vm379_vm6 = vcmask 1041408   ;;  %v1758_v42 = vld [vmem:[%s2586_s1 + $0x2] sm:$0x3]  ;;  %vm375_vm7 = vcmask 31744  }
   0xd   : > { %s1838_s7 = sshll.u32 %s2611_s30, 3  ;;  %v1669_v26 = vld [vmem:[%s2591_s6] sm:$0xf] }
   0xe   : > { %s301_s11 = scalar_lea.vmem %s2585_s0, %s1838_s7  ;;  %v2059_v8 = vand.u32 127, %v308_v7  ;;  %v1810_v27 = vld [vmem:[%s2590_s5 + $0x2] sm:$0x3]  ;;  %s306_s25 = scalar_lea.vmem %s2593_s8, %s1838_s7 }
   0xf   : > { %v2052_v0 = vld [vmem:[%s301_s11] sm:$0xff] }
  0x10   : > { %326 = vst [vmem:[#allocation1] ss:$2 sm:$0xff] %v2052_v0  ;;  %v2062_v12 = vadd.s32 128, %v2059_v8  ;;  %v313_v14 = vshra.s32 %v2059_v8, 4  ;;  %vm335_vm0 = vcmp.lt.s32.totalorder %v2059_v8, 16  ;;  %vm347_vm1 = vcmp.lt.s32.totalorder %v2059_v8, 112 }
  0x11   : > { %v311_v52 = vand.u32 15, %v2059_v8  ;;  %vm356_vm8 = vcmp.lt.s32.totalorder %v2059_v8, 1  ;;  %vm363_vm9 = vcmp.lt.s32.totalorder %v2059_v8, 127 }
  0x12   : > { %v314_v15 = vshra.s32 %v2062_v12, 4  ;;  %vm2070_vm2 = vcmp.eq.s32.totalorder %v313_v14, 15  ;;  %vm2079_vm4 = vcmp.eq.s32.totalorder %v313_v14, 0  ;;  %v312_v51 = vand.u32 15, %v2062_v12 }
  0x13   : > { %vm2142_vm11 = vcmp.eq.s32.totalorder %v311_v52, 0  ;;  %vm2154_vm13 = vcmp.eq.s32.totalorder %v311_v52, 15 }
  0x14   : > { %vm2074_vm3 = vcmp.eq.s32.totalorder %v314_v15, 15  ;;  %vm2083_vm5 = vcmp.eq.s32.totalorder %v314_v15, 0  ;;  %vm2138_vm10 = vcmp.eq.s32.totalorder %v312_v51, 0  ;;  %vm2150_vm12 = vcmp.eq.s32.totalorder %v312_v51, 15 }
  0x17   : > { %v327_v1 = vld.sshfl [vmem:[#allocation1] sm:$0xff pattern:$0x75316420]  ;;  %v328_v2 = vld.sshfl [vmem:[#allocation1 + $0x8] sm:$0xff pattern:$0x75316420] }
  0x18   : > { %v1853_v3 = vpack.i.bf16 %v328_v2, %v327_v1  ;;  %338 = vst [vmem:[#allocation1] ss:$2 sm:$0xff] %v2052_v0 }
  0x1a   : > { %1854 = vrot.lane.b32.xlu0 %v1853_v3, %s1983_s12 }
  0x1f   : > { %v339_v4 = vld.sshfl [vmem:[#allocation1] sm:$0xff pattern:$0x75316420]  ;;  %v340_v5 = vld.sshfl [vmem:[#allocation1 + $0x8] sm:$0xff pattern:$0x75316420] }
  0x20   : > { %v1858_v6 = vpack.i.bf16 %v340_v5, %v339_v4  ;;  %490 = vst [vmem:[#allocation1] ss:$2 sm:$0xff] %v2052_v0 }
  0x22   : > { %1859 = vrot.lane.b32.xlu0 %v1858_v6, %s1984_s13 }
  0x27   : > { %v491_v9 = vld.sshfl [vmem:[#allocation1] sm:$0xff pattern:$0x75316420]  ;;  %v492_v10 = vld.sshfl [vmem:[#allocation1 + $0x8] sm:$0xff pattern:$0x75316420] }
  0x28   : > { %v1873_v13 = vpack.i.bf16 %v492_v10, %v491_v9  ;;  %501 = vst [vmem:[#allocation1] ss:$2 sm:$0xff] %v2052_v0 }
  0x2a   : > { %1874 = vrot.lane.b32.xlu2 %v1873_v13, %s1985_s14 }
  0x2f   : > { %v502_v18 = vld.sshfl [vmem:[#allocation1] sm:$0xff pattern:$0x75316420]  ;;  %v503_v19 = vld.sshfl [vmem:[#allocation1 + $0x8] sm:$0xff pattern:$0x75316420] }
  0x30   : > { %v1878_v23 = vpack.i.bf16 %v503_v19, %v502_v18  ;;  %555 = vst [vmem:[#allocation1] ss:$2 sm:$0xff] %v2052_v0 }
  0x32   : > { %1879 = vrot.lane.b32.xlu2 %v1878_v23, %s1986_s15 }
  0x37   : > { %v2121_v44 = vld.sshfl [vmem:[#allocation1] sm:$0xff pattern:$0x75316420]  ;;  %v2123_v45 = vld.sshfl [vmem:[#allocation1 + $0x8] sm:$0xff pattern:$0x75316420] }
  0x38   : > { %1680 = vst [vmem:[#allocation1] ss:$2 sm:$0xff] %v2052_v0  ;;  %v560_v7 = vpack.c.bf16 %v2121_v44, %v2121_v44  ;;  %v561_v9 = vpack.c.bf16 %v2123_v45, %v2123_v45  ;;  %v1763_v45 = vld [vmem:[%s2586_s1 + $0x4] sm:$0x3] }
  0x84   : > { %v1875_v43 = vpop.permute.xlu2 %1874 }
  0x85   : > { %v1877_v47 = vunpack.i.h.bf16 %v1875_v43  ;;  %v1876_v48 = vunpack.i.l.bf16 %v1875_v43 }
  0x87   : > { %v500_v54 = vsel %vm356_vm8, %v1877_v47, %v1876_v48  ;;  %v499_v56 = vsel %vm356_vm8, %v1876_v48, %v1877_v47  ;;  %v568_v47 = vsel %vm379_vm6, %v560_v7, 0  ;;  %v571_v48 = vsel %vm379_vm6, %v561_v9, 0 }
  0x8c   : > { %v1855_v11 = vpop.permute.xlu0 %1854  ;;  %v1880_v46 = vpop.permute.xlu2 %1879 }
  0x8d   : > { %v1857_v16 = vunpack.i.h.bf16 %v1855_v11  ;;  %v1856_v17 = vunpack.i.l.bf16 %v1855_v11  ;;  %v1882_v49 = vunpack.i.h.bf16 %v1880_v46  ;;  %v1881_v50 = vunpack.i.l.bf16 %v1880_v46 }
  0x8f   : > { %v336_v28 = vsel %vm335_vm0, %v1856_v17, %v1857_v16  ;;  %v337_v29 = vsel %vm335_vm0, %v1857_v16, %v1856_v17  ;;  %v510_v55 = vsel %vm363_vm9, %v1881_v50, %v1882_v49  ;;  %v511_v57 = vsel %vm363_vm9, %v1882_v49, %v1881_v50 }
  0x90   : > { %v512_v60 = vsel %vm2142_vm11, %v510_v55, %v500_v54  ;;  %v513_v61 = vsel %vm2138_vm10, %v511_v57, %v499_v56  ;;  %v601_v12 = vsel %vm2154_vm13, %v500_v54, %v510_v55  ;;  %v602_v13 = vsel %vm2150_vm12, %v499_v56, %v511_v57 }
  0x91   : > { %v514_v62 = vpack.c.bf16 %v512_v60, %v512_v60  ;;  %v515_v63 = vpack.c.bf16 %v513_v61, %v513_v61 }
  0x93   : > { %v522_v10 = vsel %vm379_vm6, %v514_v62, 0  ;;  %v525_v11 = vsel %vm379_vm6, %v515_v63, 0 }
  0x94   : > { %v1860_v20 = vpop.permute.xlu0 %1859 }
  0x95   : > { %v1862_v24 = vunpack.i.h.bf16 %v1860_v20  ;;  %v1861_v25 = vunpack.i.l.bf16 %v1860_v20 }
  0x97   : > { %v348_v30 = vsel %vm347_vm1, %v1861_v25, %v1862_v24  ;;  %v349_v31 = vsel %vm347_vm1, %v1862_v24, %v1861_v25 }
  0x98   : > { %v2098_v32 = vsel %vm2070_vm2, %v337_v29, %v348_v30  ;;  %v2102_v33 = vsel %vm2074_vm3, %v336_v28, %v349_v31  ;;  %v350_v34 = vsel %vm2079_vm4, %v348_v30, %v337_v29  ;;  %v351_v35 = vsel %vm2083_vm5, %v349_v31, %v336_v28 }
  0x99   : > { %v1883_v36 = vpack.i.bf16 %v2102_v33, %v2098_v32  ;;  %v1863_v37 = vpack.i.bf16 %v351_v35, %v350_v34  ;;  %v371_v38 = vpack.c.bf16 %v350_v34, %v350_v34  ;;  %v372_v39 = vpack.c.bf16 %v351_v35, %v351_v35 }
  0x9a   : > { %v603_v35 = vpack.c.bf16 %v601_v12, %v601_v12  ;;  %v1987_v12 = vmov 0  }
  0x9b   : > { %1884 = vrot.lane.b32.xlu0 %v1883_v36, %s1985_s14  ;;  %1864 = vrot.lane.b32.xlu1 %v1863_v37, %s1985_s14  ;;  %v381_v40 = vsel %vm379_vm6, %v371_v38, 0  ;;  %v384_v41 = vsel %vm379_vm6, %v372_v39, 0 }
  0x9c   : > { %393 = vmatpush.bf16.msra.mxu0 %v381_v40  ;;  %406 = vmatpush.bf16.msra.mxu1 %v384_v41  ;;  %v611_v49 = vsel %vm379_vm6, %v603_v35, 0 }
  0x9d   : > { %1893 = vset.pattern.permute.xlu2 %v1987_v12  ;;  %1974 = vset.pattern.permute.xlu0 %v1987_v12 }
  0x9f   : > { %1759 = vmatmul.msk.bf16.vlgmr.msra.gmra.mxu0 %vm375_vm7, %v1758_v42  ;;  %1760 = vmatmul.msk.bf16.vlgmr.msra.gmra.mxu1 %vm375_vm7, %v1758_v42  ;;  %v370_v42 = vld [vmem:[%s2586_s1] sm:$0x3] }
  0xa3   : > { %1869 = vrot.lane.b32.xlu1 %v1863_v37, %s1986_s15 }
  0xab   : > { %1889 = vrot.lane.b32.xlu1 %v1883_v36, %s1986_s15  ;;  %v604_v36 = vpack.c.bf16 %v602_v13, %v602_v13  ;;  %v1772_v13 = vld [vmem:[%s2586_s1 + $0xa] sm:$0x3] }
 0x10d   : > { %v1865_v53 = vpop.permute.xlu1 %1864  ;;  %v1885_v14 = vpop.permute.xlu0 %1884 }
 0x10e   : > { %v1867_v0 = vunpack.i.h.bf16 %v1865_v53  ;;  %v1866_v1 = vunpack.i.l.bf16 %v1865_v53  ;;  %v1887_v31 = vunpack.i.h.bf16 %v1885_v14  ;;  %v1886_v34 = vunpack.i.l.bf16 %v1885_v14  ;;  %v1775_v14 = vld [vmem:[%s2586_s1 + $0xc] sm:$0x3] }
 0x10f   : > { %v614_v53 = vsel %vm379_vm6, %v604_v36, 0 }
 0x110   : > { %v358_v15 = vsel %vm356_vm8, %v1867_v0, %v1866_v1  ;;  %v357_v17 = vsel %vm356_vm8, %v1866_v1, %v1867_v0  ;;  %v650_v46 = vsel %vm356_vm8, %v1886_v34, %v1887_v31  ;;  %v651_v50 = vsel %vm356_vm8, %v1887_v31, %v1886_v34  ;;  %v1766_v0 = vld [vmem:[%s2586_s1 + $0x6] sm:$0x3] }
 0x111   : > { %v701_v1 = vpack.c.bf16 %v2098_v32, %v2098_v32 }
 0x113   : > { %v709_v9 = vsel %vm379_vm6, %v701_v1, 0 }
 0x115   : > { %v1870_v3 = vpop.permute.xlu1 %1869 }
 0x116   : > { %v1872_v5 = vunpack.i.h.bf16 %v1870_v3  ;;  %v1871_v6 = vunpack.i.l.bf16 %v1870_v3  ;;  %v702_v3 = vpack.c.bf16 %v2102_v33, %v2102_v33 }
 0x118   : > { %v364_v16 = vsel %vm363_vm9, %v1871_v6, %v1872_v5  ;;  %v365_v18 = vsel %vm363_vm9, %v1872_v5, %v1871_v6  ;;  %v1769_v5 = vld [vmem:[%s2586_s1 + $0x8] sm:$0x3]  ;;  %v712_v32 = vsel %vm379_vm6, %v702_v3, 0 }
 0x119   : > { %v366_v19 = vsel %vm2142_vm11, %v364_v16, %v358_v15  ;;  %v367_v20 = vsel %vm2138_vm10, %v365_v18, %v357_v17  ;;  %v447_v23 = vsel %vm2154_vm13, %v358_v15, %v364_v16  ;;  %v448_v24 = vsel %vm2150_vm12, %v357_v17, %v365_v18  ;;  %v1778_v15 = vld [vmem:[%s2586_s1 + $0xe] sm:$0x3]  ;;  %v1781_v16 = vld [vmem:[%s2586_s1 + $0x10] sm:$0x3] }
 0x11a   : > { %v368_v25 = vpack.c.bf16 %v366_v19, %v366_v19  ;;  %v369_v28 = vpack.c.bf16 %v367_v20, %v367_v20  ;;  %v449_v29 = vpack.c.bf16 %v447_v23, %v447_v23  ;;  %v450_v30 = vpack.c.bf16 %v448_v24, %v448_v24 }
 0x11c   : > { %v416_v37 = vsel %vm379_vm6, %v368_v25, 0  ;;  %v419_v38 = vsel %vm379_vm6, %v369_v28, 0  ;;  %v457_v39 = vsel %vm379_vm6, %v449_v29, 0  ;;  %v460_v40 = vsel %vm379_vm6, %v450_v30, 0  ;;  %v395_v17 = vpop.f32.mrf.mxu0  ;;  %v408_v18 = vpop.f32.mrf.mxu1 }
 0x11d   : > { %v1890_v41 = vpop.permute.xlu1 %1889  ;;  %428 = vmatpush.bf16.msra.mxu2 %v416_v37  ;;  %441 = vmatpush.bf16.msra.mxu3 %v419_v38 }
 0x11e   : > { %v1892_v43 = vunpack.i.h.bf16 %v1890_v41  ;;  %v1891_v44 = vunpack.i.l.bf16 %v1890_v41  ;;  %469 = vmatpush.bf16.msrb.mxu0 %v457_v39  ;;  %482 = vmatpush.bf16.msrb.mxu1 %v460_v40 }
 0x120   : > { %v656_v51 = vsel %vm363_vm9, %v1891_v44, %v1892_v43  ;;  %v657_v52 = vsel %vm363_vm9, %v1892_v43, %v1891_v44  ;;  %1761 = vmatmul.msk.bf16.vlgmr.msra.gmra.mxu2 %vm375_vm7, %v370_v42  ;;  %1762 = vmatmul.msk.bf16.vlgmr.msra.gmra.mxu3 %vm375_vm7, %v370_v42 }
 0x121   : > { %534 = vmatpush.bf16.msrb.mxu2 %v522_v10  ;;  %547 = vmatpush.bf16.msrb.mxu3 %v525_v11  ;;  %v658_v54 = vsel %vm2142_vm11, %v656_v51, %v651_v50  ;;  %v659_v55 = vsel %vm2138_vm10, %v657_v52, %v650_v46  ;;  %v742_v62 = vsel %vm2154_vm13, %v651_v50, %v656_v51  ;;  %v785_v11 = vld [vmem:[%s2587_s2] sm:$0xf] }
 0x122   : > { %1764 = vmatmul.msk.bf16.vlgmr.msrb.gmra.mxu0 %vm375_vm7, %v1763_v45  ;;  %1765 = vmatmul.msk.bf16.vlgmr.msrb.gmra.mxu1 %vm375_vm7, %v1763_v45  ;;  %v660_v56 = vpack.c.bf16 %v658_v54, %v658_v54  ;;  %v661_v57 = vpack.c.bf16 %v659_v55, %v659_v55  ;;  %v743_v63 = vsel %vm2150_vm12, %v650_v46, %v657_v52 }
 0x123   : > { %580 = vmatpush.bf16.msra.mxu0 %v568_v47  ;;  %593 = vmatpush.bf16.msra.mxu1 %v571_v48  ;;  %v744_v6 = vpack.c.bf16 %v742_v62, %v742_v62  ;;  %v745_v7 = vpack.c.bf16 %v743_v63, %v743_v63 }
 0x124   : > { %v668_v60 = vsel %vm379_vm6, %v660_v56, 0  ;;  %v671_v61 = vsel %vm379_vm6, %v661_v57, 0  ;;  %788 = vperm.xlu2 %1893, %v785_v11   ;;  %v397_v19 = vpop.f32.mrf.mxu0  ;;  %v410_v20 = vpop.f32.mrf.mxu1 }
 0x125   : > { %623 = vmatpush.bf16.msra.mxu2 %v611_v49  ;;  %636 = vmatpush.bf16.msra.mxu3 %v614_v53  ;;  %v752_v33 = vsel %vm379_vm6, %v744_v6, 0  ;;  %v755_v10 = vsel %vm379_vm6, %v745_v7, 0 }
 0x127   : > { %680 = vmatpush.bf16.msrb.mxu0 %v668_v60  ;;  %693 = vmatpush.bf16.msrb.mxu1 %v671_v61 }
 0x130   : > { %1767 = vmatmul.msk.bf16.vlgmr.msrb.gmra.mxu2 %vm375_vm7, %v1766_v0  ;;  %1768 = vmatmul.msk.bf16.vlgmr.msrb.gmra.mxu3 %vm375_vm7, %v1766_v0 }
 0x131   : > { %721 = vmatpush.bf16.msrb.mxu2 %v709_v9  ;;  %734 = vmatpush.bf16.msrb.mxu3 %v712_v32 }
 0x132   : > { %1770 = vmatmul.msk.bf16.vlgmr.msra.gmra.mxu0 %vm375_vm7, %v1769_v5  ;;  %1771 = vmatmul.msk.bf16.vlgmr.msra.gmra.mxu1 %vm375_vm7, %v1769_v5 }
 0x133   : > { %764 = vmatpush.bf16.msra.mxu0 %v752_v33  ;;  %777 = vmatpush.bf16.msra.mxu1 %v755_v10 }
 0x140   : > { %1773 = vmatmul.msk.bf16.vlgmr.msra.gmra.mxu2 %vm375_vm7, %v1772_v13  ;;  %1774 = vmatmul.msk.bf16.vlgmr.msra.gmra.mxu3 %vm375_vm7, %v1772_v13 }
 0x142   : > { %1776 = vmatmul.msk.bf16.vlgmr.msrb.gmra.mxu0 %vm375_vm7, %v1775_v14  ;;  %1777 = vmatmul.msk.bf16.vlgmr.msrb.gmra.mxu1 %vm375_vm7, %v1775_v14 }
 0x150   : > { %1779 = vmatmul.msk.bf16.vlgmr.msrb.gmra.mxu2 %vm375_vm7, %v1778_v15  ;;  %1780 = vmatmul.msk.bf16.vlgmr.msrb.gmra.mxu3 %vm375_vm7, %v1778_v15 }
 0x152   : > { %1782 = vmatmul.msk.bf16.vlgmr.msra.gmra.mxu0 %vm375_vm7, %v1781_v16  ;;  %1783 = vmatmul.msk.bf16.vlgmr.msra.gmra.mxu1 %vm375_vm7, %v1781_v16 }
 0x17e   : > { %v789_v32 = vpop.permute.xlu2 %788 }
 0x19f   : > { %v471_v23 = vpop.f32.mrf.mxu0  ;;  %v484_v24 = vpop.f32.mrf.mxu1 }
 0x1a3   : > { %v430_v25 = vpop.f32.mrf.mxu2  ;;  %v443_v28 = vpop.f32.mrf.mxu3 }
 0x1a4   : > { %v431_v45 = vadd.f32 %v430_v25, %v395_v17  ;;  %v444_v46 = vadd.f32 %v443_v28, %v408_v18 }
 0x1a6   : > { %v488_v49 = vadd.f32 %v471_v23, %v431_v45  ;;  %v489_v50 = vadd.f32 %v484_v24, %v444_v46 }
 0x1a7   : > { %v473_v29 = vpop.f32.mrf.mxu0  ;;  %v486_v30 = vpop.f32.mrf.mxu1 }
 0x1ab   : > { %v432_v31 = vpop.f32.mrf.mxu2  ;;  %v445_v34 = vpop.f32.mrf.mxu3 }
 0x1af   : > { %v582_v35 = vpop.f32.mrf.mxu0  ;;  %v595_v36 = vpop.f32.mrf.mxu1 }
 0x1b3   : > { %v536_v37 = vpop.f32.mrf.mxu2  ;;  %v549_v38 = vpop.f32.mrf.mxu3 }
 0x1b4   : > { %v553_v53 = vadd.f32 %v536_v37, %v488_v49  ;;  %v554_v54 = vadd.f32 %v549_v38, %v489_v50  ;;  %v1784_v49 = vld [vmem:[%s2588_s3 + $0x2] sm:$0x3] }
 0x1b6   : > { %v599_v57 = vadd.f32 %v582_v35, %v553_v53  ;;  %v600_v60 = vadd.f32 %v595_v36, %v554_v54 }
 0x1b7   : > { %v584_v39 = vpop.f32.mrf.mxu0  ;;  %v597_v40 = vpop.f32.mrf.mxu1 }
 0x1bb   : > { %v538_v41 = vpop.f32.mrf.mxu2  ;;  %v551_v42 = vpop.f32.mrf.mxu3 }
 0x1bf   : > { %v682_v43 = vpop.f32.mrf.mxu0  ;;  %v695_v44 = vpop.f32.mrf.mxu1 }
 0x1c3   : > { %v625_v47 = vpop.f32.mrf.mxu2  ;;  %v638_v48 = vpop.f32.mrf.mxu3 }
 0x1c4   : > { %v642_v61 = vadd.f32 %v625_v47, %v599_v57  ;;  %v643_v62 = vadd.f32 %v638_v48, %v600_v60  ;;  %v1227_v48 = vld [vmem:[%s2589_s4] sm:$0xf] }
 0x1c6   : > { %v699_v1 = vadd.f32 %v682_v43, %v642_v61  ;;  %v700_v3 = vadd.f32 %v695_v44, %v643_v62 }
 0x1c7   : > { %v684_v51 = vpop.f32.mrf.mxu0  ;;  %v697_v52 = vpop.f32.mrf.mxu1 }
 0x1cb   : > { %v627_v55 = vpop.f32.mrf.mxu2  ;;  %v640_v56 = vpop.f32.mrf.mxu3 }
 0x1cf   : > { %v766_v63 = vpop.f32.mrf.mxu0  ;;  %v779_v0 = vpop.f32.mrf.mxu1 }
 0x1d3   : > { %v723_v5 = vpop.f32.mrf.mxu2  ;;  %v736_v6 = vpop.f32.mrf.mxu3 }
 0x1d4   : > { %v740_v7 = vadd.f32 %v723_v5, %v699_v1  ;;  %v741_v9 = vadd.f32 %v736_v6, %v700_v3 }
 0x1d6   : > { %v783_v33 = vadd.f32 %v766_v63, %v740_v7  ;;  %v784_v10 = vadd.f32 %v779_v0, %v741_v9 }
 0x1d7   : > { %v768_v11 = vpop.f32.mrf.mxu0  ;;  %v781_v12 = vpop.f32.mrf.mxu1 }
 0x1d8   : > { %v791_v13 = vadd.f32 %v789_v32, %v783_v33  ;;  %v792_v14 = vadd.f32 %v789_v32, %v784_v10 }
 0x1da   : > { %vm793_vm14 = vcmp.gt.f32.partialorder %v791_v13, 0.0  ;;  %vm794_vm15 = vcmp.gt.f32.partialorder %v792_v14, 0.0  ;;  %v795_v15 = vmul.f32 0.1, %v791_v13  ;;  %v796_v16 = vmul.f32 0.1, %v792_v14 }
 0x1db   : > { %v725_v17 = vpop.f32.mrf.mxu2  ;;  %v738_v18 = vpop.f32.mrf.mxu3 }
 0x1dc   : > { %v2261_v19 = vsel %vm793_vm14, %v791_v13, %v795_v15  ;;  %v2263_v20 = vsel %vm794_vm15, %v792_v14, %v796_v16 }
 0x1dd   : > { %v1899_v23 = vpack.i.bf16 %v2263_v20, %v2261_v19 }
 0x1df   : > { %1900 = vrot.lane.b32.xlu1 %v1899_v23, %s1984_s13  ;;  %1895 = vrot.lane.b32.xlu0 %v1899_v23, %s1983_s12 }
 0x1e7   : > { %1915 = vrot.lane.b32.xlu1 %v1899_v23, %s1985_s14 }
 0x251   : > { %v1901_v24 = vpop.permute.xlu1 %1900  ;;  %v1896_v25 = vpop.permute.xlu0 %1895 }
 0x252   : > { %v1903_v28 = vunpack.i.h.bf16 %v1901_v24  ;;  %v1902_v29 = vunpack.i.l.bf16 %v1901_v24  ;;  %v1898_v30 = vunpack.i.h.bf16 %v1896_v25  ;;  %v1897_v31 = vunpack.i.l.bf16 %v1896_v25 }
 0x254   : > { %v809_v34 = vsel %vm347_vm1, %v1902_v29, %v1903_v28  ;;  %v810_v35 = vsel %vm347_vm1, %v1903_v28, %v1902_v29  ;;  %v803_v36 = vsel %vm335_vm0, %v1897_v31, %v1898_v30  ;;  %v804_v37 = vsel %vm335_vm0, %v1898_v30, %v1897_v31 }
 0x255   : > { %v2280_v38 = vsel %vm2070_vm2, %v804_v37, %v809_v34  ;;  %v2284_v39 = vsel %vm2074_vm3, %v803_v36, %v810_v35  ;;  %v811_v40 = vsel %vm2079_vm4, %v809_v34, %v804_v37  ;;  %v812_v41 = vsel %vm2083_vm5, %v810_v35, %v803_v36 }
 0x256   : > { %v1929_v42 = vpack.i.bf16 %v2284_v39, %v2280_v38  ;;  %v1909_v43 = vpack.i.bf16 %v812_v41, %v811_v40  ;;  %v830_v44 = vpack.c.bf16 %v811_v40, %v811_v40  ;;  %v831_v45 = vpack.c.bf16 %v812_v41, %v812_v41 }
 0x257   : > { %v1002_v34 = vpack.c.bf16 %v2261_v19, %v2261_v19  ;;  %v1003_v35 = vpack.c.bf16 %v2263_v20, %v2263_v20 }
 0x258   : > { %1930 = vrot.lane.b32.xlu1 %v1929_v42, %s1986_s15  ;;  %1910 = vrot.lane.b32.xlu0 %v1909_v43, %s1986_s15  ;;  %v838_v46 = vsel %vm379_vm6, %v830_v44, 0  ;;  %v841_v47 = vsel %vm379_vm6, %v831_v45, 0 }
 0x259   : > { %1905 = vrot.lane.b32.xlu2 %v1909_v43, %s1985_s14  ;;  %850 = vmatpush.bf16.msra.mxu2 %v838_v46  ;;  %v1916_v52 = vpop.permute.xlu1 %1915 }
 0x25a   : > { %863 = vmatpush.bf16.msra.mxu3 %v841_v47  ;;  %v1918_v55 = vunpack.i.h.bf16 %v1916_v52  ;;  %v1917_v56 = vunpack.i.l.bf16 %v1916_v52  ;;  %v829_v47 = vld [vmem:[%s2588_s3] sm:$0x3] }
 0x25c   : > { %1785 = vmatmul.msk.bf16.vlgmr.msra.gmra.mxu2 %vm375_vm7, %v1784_v49  ;;  %v951_v63 = vsel %vm356_vm8, %v1917_v56, %v1918_v55  ;;  %v952_v0 = vsel %vm356_vm8, %v1918_v55, %v1917_v56 }
 0x25d   : > { %1786 = vmatmul.msk.bf16.vlgmr.msra.gmra.mxu3 %vm375_vm7, %v1784_v49  ;;  %v1010_v49 = vsel %vm379_vm6, %v1002_v34, 0 }
 0x260   : > { %1925 = vrot.lane.b32.xlu0 %v1929_v42, %s1985_s14 }
 0x261   : > { %1920 = vrot.lane.b32.xlu2 %v1899_v23, %s1986_s15 }
 0x269   : > { %1230 = vperm.xlu2 %1893, %v1227_v48  }
 0x2b3   : > { %v1906_v50 = vpop.permute.xlu2 %1905 }
 0x2b4   : > { %v1908_v61 = vunpack.i.h.bf16 %v1906_v50  ;;  %v1907_v62 = vunpack.i.l.bf16 %v1906_v50  ;;  %v1013_v50 = vsel %vm379_vm6, %v1003_v35, 0 }
 0x2b6   : > { %v817_v9 = vsel %vm356_vm8, %v1907_v62, %v1908_v61  ;;  %v818_v32 = vsel %vm356_vm8, %v1908_v61, %v1907_v62 }
 0x2bb   : > { %v1921_v51 = vpop.permute.xlu2 %1920 }
 0x2bc   : > { %v1923_v53 = vunpack.i.h.bf16 %v1921_v51  ;;  %v1922_v54 = vunpack.i.l.bf16 %v1921_v51  ;;  %v1789_v51 = vld [vmem:[%s2588_s3 + $0x4] sm:$0x3] }
 0x2be   : > { %v957_v57 = vsel %vm363_vm9, %v1922_v54, %v1923_v53  ;;  %v958_v60 = vsel %vm363_vm9, %v1923_v53, %v1922_v54 }
 0x2bf   : > { %v959_v3 = vsel %vm2142_vm11, %v957_v57, %v952_v0  ;;  %v960_v5 = vsel %vm2138_vm10, %v958_v60, %v951_v63  ;;  %v1043_v33 = vsel %vm2154_vm13, %v952_v0, %v957_v57  ;;  %v1044_v10 = vsel %vm2150_vm12, %v951_v63, %v958_v60 }
 0x2c0   : > { %v961_v14 = vpack.c.bf16 %v959_v3, %v959_v3  ;;  %v962_v15 = vpack.c.bf16 %v960_v5, %v960_v5  ;;  %v1045_v43 = vpack.c.bf16 %v1043_v33, %v1043_v33  ;;  %v1046_v44 = vpack.c.bf16 %v1044_v10, %v1044_v10  ;;  %v1792_v5 = vld [vmem:[%s2588_s3 + $0x6] sm:$0x3] }
 0x2c2   : > { %v969_v19 = vsel %vm379_vm6, %v961_v14, 0  ;;  %v972_v20 = vsel %vm379_vm6, %v962_v15, 0  ;;  %v1053_v57 = vsel %vm379_vm6, %v1045_v43, 0  ;;  %v1056_v60 = vsel %vm379_vm6, %v1046_v44, 0  ;;  %v1804_v14 = vld [vmem:[%s2588_s3 + $0xe] sm:$0x3] }
 0x2c3   : > { %v1807_v15 = vld [vmem:[%s2588_s3 + $0x10] sm:$0x3] }
 0x2ca   : > { %v1911_v1 = vpop.permute.xlu0 %1910  ;;  %v1931_v11 = vpop.permute.xlu1 %1930 }
 0x2cb   : > { %v1913_v6 = vunpack.i.h.bf16 %v1911_v1  ;;  %v1912_v7 = vunpack.i.l.bf16 %v1911_v1  ;;  %v1933_v30 = vunpack.i.h.bf16 %v1931_v11  ;;  %v1932_v31 = vunpack.i.l.bf16 %v1931_v11 }
 0x2cd   : > { %v823_v12 = vsel %vm363_vm9, %v1912_v7, %v1913_v6  ;;  %v824_v13 = vsel %vm363_vm9, %v1913_v6, %v1912_v7  ;;  %v1098_v48 = vsel %vm363_vm9, %v1932_v31, %v1933_v30  ;;  %v1099_v52 = vsel %vm363_vm9, %v1933_v30, %v1932_v31 }
 0x2ce   : > { %v825_v16 = vsel %vm2142_vm11, %v823_v12, %v818_v32  ;;  %v826_v17 = vsel %vm2138_vm10, %v824_v13, %v817_v9  ;;  %v904_v18 = vsel %vm2154_vm13, %v818_v32, %v823_v12  ;;  %v905_v23 = vsel %vm2150_vm12, %v817_v9, %v824_v13  ;;  %v1795_v9 = vld [vmem:[%s2588_s3 + $0x8] sm:$0x3]  ;;  %v1798_v12 = vld [vmem:[%s2588_s3 + $0xa] sm:$0x3]  ;;  %v1801_v13 = vld [vmem:[%s2588_s3 + $0xc] sm:$0x3] }
 0x2cf   : > { %v827_v24 = vpack.c.bf16 %v825_v16, %v825_v16  ;;  %v828_v25 = vpack.c.bf16 %v826_v17, %v826_v17  ;;  %v906_v28 = vpack.c.bf16 %v904_v18, %v904_v18  ;;  %v907_v29 = vpack.c.bf16 %v905_v23, %v905_v23 }
 0x2d0   : > { %v1143_v6 = vpack.c.bf16 %v2280_v38, %v2280_v38  ;;  %v1144_v7 = vpack.c.bf16 %v2284_v39, %v2284_v39 }
 0x2d1   : > { %v873_v36 = vsel %vm379_vm6, %v827_v24, 0  ;;  %v876_v37 = vsel %vm379_vm6, %v828_v25, 0  ;;  %v914_v40 = vsel %vm379_vm6, %v906_v28, 0  ;;  %v917_v41 = vsel %vm379_vm6, %v907_v29, 0 }
 0x2d2   : > { %v1926_v42 = vpop.permute.xlu0 %1925  ;;  %885 = vmatpush.bf16.msrb.mxu0 %v873_v36  ;;  %898 = vmatpush.bf16.msrb.mxu1 %v876_v37  ;;  %v1151_v10 = vsel %vm379_vm6, %v1143_v6, 0  ;;  %v1154_v38 = vsel %vm379_vm6, %v1144_v7, 0 }
 0x2d3   : > { %v1928_v45 = vunpack.i.h.bf16 %v1926_v42  ;;  %v1927_v46 = vunpack.i.l.bf16 %v1926_v42  ;;  %926 = vmatpush.bf16.msrb.mxu2 %v914_v40  ;;  %939 = vmatpush.bf16.msrb.mxu3 %v917_v41 }
 0x2d5   : > { %v1092_v53 = vsel %vm356_vm8, %v1927_v46, %v1928_v45  ;;  %v1093_v54 = vsel %vm356_vm8, %v1928_v45, %v1927_v46  ;;  %1787 = vmatmul.msk.bf16.vlgmr.msrb.gmra.mxu0 %vm375_vm7, %v829_v47  ;;  %1788 = vmatmul.msk.bf16.vlgmr.msrb.gmra.mxu1 %vm375_vm7, %v829_v47 }
 0x2d6   : > { %981 = vmatpush.bf16.msra.mxu0 %v969_v19  ;;  %994 = vmatpush.bf16.msra.mxu1 %v972_v20  ;;  %v1100_v55 = vsel %vm2142_vm11, %v1098_v48, %v1093_v54  ;;  %v1101_v56 = vsel %vm2138_vm10, %v1099_v52, %v1092_v53  ;;  %v1184_v1 = vsel %vm2154_vm13, %v1093_v54, %v1098_v48 }
 0x2d7   : > { %1022 = vmatpush.bf16.msra.mxu2 %v1010_v49  ;;  %1035 = vmatpush.bf16.msra.mxu3 %v1013_v50  ;;  %v1102_v61 = vpack.c.bf16 %v1100_v55, %v1100_v55  ;;  %v1103_v62 = vpack.c.bf16 %v1101_v56, %v1101_v56  ;;  %v1185_v3 = vsel %vm2150_vm12, %v1092_v53, %v1099_v52 }
 0x2d8   : > { %1790 = vmatmul.msk.bf16.vlgmr.msrb.gmra.mxu2 %vm375_vm7, %v1789_v51  ;;  %1791 = vmatmul.msk.bf16.vlgmr.msrb.gmra.mxu3 %vm375_vm7, %v1789_v51  ;;  %v1186_v32 = vpack.c.bf16 %v1184_v1, %v1184_v1  ;;  %v1187_v33 = vpack.c.bf16 %v1185_v3, %v1185_v3 }
 0x2d9   : > { %v1110_v63 = vsel %vm379_vm6, %v1102_v61, 0  ;;  %v1113_v0 = vsel %vm379_vm6, %v1103_v62, 0 }
 0x2da   : > { %1065 = vmatpush.bf16.msrb.mxu0 %v1053_v57  ;;  %1078 = vmatpush.bf16.msrb.mxu1 %v1056_v60  ;;  %v1194_v39 = vsel %vm379_vm6, %v1186_v32, 0  ;;  %v1197_v11 = vsel %vm379_vm6, %v1187_v33, 0 }
 0x2db   : > { %1122 = vmatpush.bf16.msrb.mxu2 %v1110_v63  ;;  %1135 = vmatpush.bf16.msrb.mxu3 %v1113_v0 }
 0x2df   : > { %v852_v16 = vpop.f32.mrf.mxu2 }
 0x2e0   : > { %v865_v17 = vpop.f32.mrf.mxu3 }
 0x2e5   : > { %1793 = vmatmul.msk.bf16.vlgmr.msra.gmra.mxu0 %vm375_vm7, %v1792_v5  ;;  %1794 = vmatmul.msk.bf16.vlgmr.msra.gmra.mxu1 %vm375_vm7, %v1792_v5 }
 0x2e6   : > { %1163 = vmatpush.bf16.msra.mxu0 %v1151_v10  ;;  %1176 = vmatpush.bf16.msra.mxu1 %v1154_v38 }
 0x2e7   : > { %v854_v18 = vpop.f32.mrf.mxu2 }
 0x2e8   : > { %1796 = vmatmul.msk.bf16.vlgmr.msra.gmra.mxu2 %vm375_vm7, %v1795_v9  ;;  %1797 = vmatmul.msk.bf16.vlgmr.msra.gmra.mxu3 %vm375_vm7, %v1795_v9  ;;  %v867_v23 = vpop.f32.mrf.mxu3 }
 0x2e9   : > { %1206 = vmatpush.bf16.msra.mxu2 %v1194_v39  ;;  %1219 = vmatpush.bf16.msra.mxu3 %v1197_v11  ;;  %v1231_v11 = vpop.permute.xlu2 %1230 }
 0x2f5   : > { %1799 = vmatmul.msk.bf16.vlgmr.msrb.gmra.mxu0 %vm375_vm7, %v1798_v12  ;;  %1800 = vmatmul.msk.bf16.vlgmr.msrb.gmra.mxu1 %vm375_vm7, %v1798_v12 }
 0x2f8   : > { %1802 = vmatmul.msk.bf16.vlgmr.msrb.gmra.mxu2 %vm375_vm7, %v1801_v13  ;;  %1803 = vmatmul.msk.bf16.vlgmr.msrb.gmra.mxu3 %vm375_vm7, %v1801_v13 }
 0x305   : > { %1805 = vmatmul.msk.bf16.vlgmr.msra.gmra.mxu0 %vm375_vm7, %v1804_v14  ;;  %1806 = vmatmul.msk.bf16.vlgmr.msra.gmra.mxu1 %vm375_vm7, %v1804_v14 }
 0x308   : > { %1808 = vmatmul.msk.bf16.vlgmr.msra.gmra.mxu2 %vm375_vm7, %v1807_v15  ;;  %1809 = vmatmul.msk.bf16.vlgmr.msra.gmra.mxu3 %vm375_vm7, %v1807_v15 }
 0x352   : > { %v887_v24 = vpop.f32.mrf.mxu0  ;;  %v900_v25 = vpop.f32.mrf.mxu1 }
 0x353   : > { %v888_v50 = vadd.f32 %v887_v24, %v852_v16  ;;  %v901_v51 = vadd.f32 %v900_v25, %v865_v17 }
 0x35a   : > { %v889_v30 = vpop.f32.mrf.mxu0  ;;  %v902_v31 = vpop.f32.mrf.mxu1 }
 0x35b   : > { %v928_v28 = vpop.f32.mrf.mxu2  ;;  %v941_v29 = vpop.f32.mrf.mxu3 }
 0x35c   : > { %v945_v52 = vadd.f32 %v928_v28, %v888_v50  ;;  %v946_v53 = vadd.f32 %v941_v29, %v901_v51 }
 0x362   : > { %v983_v36 = vpop.f32.mrf.mxu0  ;;  %v996_v37 = vpop.f32.mrf.mxu1 }
 0x363   : > { %v930_v34 = vpop.f32.mrf.mxu2  ;;  %v943_v35 = vpop.f32.mrf.mxu3  ;;  %v1000_v54 = vadd.f32 %v983_v36, %v945_v52  ;;  %v1001_v55 = vadd.f32 %v996_v37, %v946_v53 }
 0x36a   : > { %v985_v42 = vpop.f32.mrf.mxu0  ;;  %v998_v43 = vpop.f32.mrf.mxu1 }
 0x36b   : > { %v1024_v40 = vpop.f32.mrf.mxu2  ;;  %v1037_v41 = vpop.f32.mrf.mxu3 }
 0x36c   : > { %v1041_v60 = vadd.f32 %v1024_v40, %v1000_v54  ;;  %v1042_v61 = vadd.f32 %v1037_v41, %v1001_v55 }
 0x372   : > { %v1067_v46 = vpop.f32.mrf.mxu0  ;;  %v1080_v19 = vpop.f32.mrf.mxu1 }
 0x373   : > { %v1026_v44 = vpop.f32.mrf.mxu2  ;;  %v1039_v45 = vpop.f32.mrf.mxu3  ;;  %v1084_v0 = vadd.f32 %v1067_v46, %v1041_v60  ;;  %v1085_v1 = vadd.f32 %v1080_v19, %v1042_v61 }
 0x37a   : > { %v1069_v48 = vpop.f32.mrf.mxu0  ;;  %v1082_v49 = vpop.f32.mrf.mxu1 }
 0x37b   : > { %v1124_v20 = vpop.f32.mrf.mxu2  ;;  %v1137_v47 = vpop.f32.mrf.mxu3 }
 0x37c   : > { %v1141_v3 = vadd.f32 %v1124_v20, %v1084_v0  ;;  %v1142_v5 = vadd.f32 %v1137_v47, %v1085_v1 }
 0x382   : > { %v1165_v62 = vpop.f32.mrf.mxu0  ;;  %v1178_v63 = vpop.f32.mrf.mxu1 }
 0x383   : > { %v1126_v56 = vpop.f32.mrf.mxu2  ;;  %v1139_v57 = vpop.f32.mrf.mxu3  ;;  %v1182_v6 = vadd.f32 %v1165_v62, %v1141_v3  ;;  %v1183_v7 = vadd.f32 %v1178_v63, %v1142_v5 }
 0x38a   : > { %v1167_v38 = vpop.f32.mrf.mxu0  ;;  %v1180_v39 = vpop.f32.mrf.mxu1 }
 0x38b   : > { %v1208_v9 = vpop.f32.mrf.mxu2  ;;  %v1221_v32 = vpop.f32.mrf.mxu3 }
 0x38c   : > { %v1225_v33 = vadd.f32 %v1208_v9, %v1182_v6  ;;  %v1226_v10 = vadd.f32 %v1221_v32, %v1183_v7 }
 0x38e   : > { %v1233_v12 = vadd.f32 %v1231_v11, %v1225_v33  ;;  %v1234_v13 = vadd.f32 %v1231_v11, %v1226_v10 }
 0x390   : > { %vm1235_vm14 = vcmp.gt.f32.partialorder %v1233_v12, 0.0  ;;  %v1237_v14 = vmul.f32 0.1, %v1233_v12  ;;  %vm1236_vm15 = vcmp.gt.f32.partialorder %v1234_v13, 0.0  ;;  %v1238_v15 = vmul.f32 0.1, %v1234_v13 }
 0x392   : > { %v2419_v16 = vsel %vm1235_vm14, %v1233_v12, %v1237_v14  ;;  %v2421_v17 = vsel %vm1236_vm15, %v1234_v13, %v1238_v15 }
 0x393   : > { %v1210_v18 = vpop.f32.mrf.mxu2  ;;  %v1223_v23 = vpop.f32.mrf.mxu3  ;;  %v1939_v24 = vpack.i.bf16 %v2421_v17, %v2419_v16 }
 0x395   : > { %1940 = vrot.lane.b32.xlu1 %v1939_v24, %s1984_s13  ;;  %1935 = vrot.lane.b32.xlu0 %v1939_v24, %s1983_s12  ;;  %s323_s12 = sld [smem:[#allocation2]] }
 0x39d   : > { %1955 = vrot.lane.b32.xlu1 %v1939_v24, %s1985_s14 }
 0x407   : > { %v1941_v25 = vpop.permute.xlu1 %1940  ;;  %v1936_v28 = vpop.permute.xlu0 %1935 }
 0x408   : > { %v1943_v29 = vunpack.i.h.bf16 %v1941_v25  ;;  %v1942_v30 = vunpack.i.l.bf16 %v1941_v25  ;;  %v1938_v31 = vunpack.i.h.bf16 %v1936_v28  ;;  %v1937_v34 = vunpack.i.l.bf16 %v1936_v28 }
 0x40a   : > { %v1251_v35 = vsel %vm347_vm1, %v1942_v30, %v1943_v29  ;;  %v1252_v36 = vsel %vm347_vm1, %v1943_v29, %v1942_v30  ;;  %v1245_v37 = vsel %vm335_vm0, %v1937_v34, %v1938_v31  ;;  %v1246_v40 = vsel %vm335_vm0, %v1938_v31, %v1937_v34 }
 0x40b   : > { %v2438_v41 = vsel %vm2070_vm2, %v1246_v40, %v1251_v35  ;;  %v2442_v42 = vsel %vm2074_vm3, %v1245_v37, %v1252_v36  ;;  %v1253_v43 = vsel %vm2079_vm4, %v1251_v35, %v1246_v40  ;;  %v1254_v44 = vsel %vm2083_vm5, %v1252_v36, %v1245_v37 }
 0x40c   : > { %v1969_v45 = vpack.i.bf16 %v2442_v42, %v2438_v41  ;;  %v1949_v46 = vpack.i.bf16 %v1254_v44, %v1253_v43  ;;  %v1272_v19 = vpack.c.bf16 %v1253_v43, %v1253_v43  ;;  %v1273_v20 = vpack.c.bf16 %v1254_v44, %v1254_v44 }
 0x40d   : > { %v1444_v29 = vpack.c.bf16 %v2419_v16, %v2419_v16  ;;  %v1445_v30 = vpack.c.bf16 %v2421_v17, %v2421_v17  ;;  %vm1690_vm0 = vcmask 1043456  }
 0x40e   : > { %1970 = vrot.lane.b32.xlu1 %v1969_v45, %s1986_s15  ;;  %1950 = vrot.lane.b32.xlu0 %v1949_v46, %s1986_s15  ;;  %v1280_v21 = vsel %vm379_vm6, %v1272_v19, 0  ;;  %v1283_v22 = vsel %vm379_vm6, %v1273_v20, 0 }
 0x40f   : > { %1945 = vrot.lane.b32.xlu2 %v1949_v46, %s1985_s14  ;;  %1292 = vmatpush.bf16.msrb.mxu0 %v1280_v21  ;;  %v1956_v49 = vpop.permute.xlu1 %1955  ;;  %v1271_v46 = vld [vmem:[%s2590_s5] sm:$0x3]  ;;  %v1452_v20 = vsel %vm379_vm6, %v1444_v29, 0  ;;  %v1455_v21 = vsel %vm379_vm6, %v1445_v30, 0 }
 0x410   : > { %1305 = vmatpush.bf16.msrb.mxu1 %v1283_v22  ;;  %v1958_v52 = vunpack.i.h.bf16 %v1956_v49  ;;  %v1957_v53 = vunpack.i.l.bf16 %v1956_v49  ;;  %v1815_v22 = vld [vmem:[%s2590_s5 + $0x4] sm:$0x3] }
 0x412   : > { %1811 = vmatmul.msk.bf16.vlgmr.msrb.gmra.mxu0 %vm375_vm7, %v1810_v27  ;;  %v1393_v60 = vsel %vm356_vm8, %v1957_v53, %v1958_v52  ;;  %v1394_v61 = vsel %vm356_vm8, %v1958_v52, %v1957_v53 }
 0x413   : > { %1812 = vmatmul.msk.bf16.vlgmr.msrb.gmra.mxu1 %vm375_vm7, %v1810_v27 }
 0x416   : > { %1965 = vrot.lane.b32.xlu0 %v1969_v45, %s1985_s14 }
 0x417   : > { %1960 = vrot.lane.b32.xlu2 %v1939_v24, %s1986_s15 }
 0x41f   : > { %1672 = vperm.xlu2 %1893, %v1669_v26  }
 0x469   : > { %v1946_v47 = vpop.permute.xlu2 %1945 }
 0x46a   : > { %v1948_v56 = vunpack.i.h.bf16 %v1946_v47  ;;  %v1947_v57 = vunpack.i.l.bf16 %v1946_v47 }
 0x46c   : > { %v1259_v5 = vsel %vm356_vm8, %v1947_v57, %v1948_v56  ;;  %v1260_v6 = vsel %vm356_vm8, %v1948_v56, %v1947_v57  ;;  %v1585_v56 = vpack.c.bf16 %v2438_v41, %v2438_v41  ;;  %v1586_v57 = vpack.c.bf16 %v2442_v42, %v2442_v42 }
 0x46e   : > { %v1593_v2 = vsel %vm379_vm6, %v1585_v56, 0  ;;  %v1596_v41 = vsel %vm379_vm6, %v1586_v57, 0  ;;  %v1677_v56 = vstv %s323_s12 }
 0x471   : > { %v1961_v48 = vpop.permute.xlu2 %1960 }
 0x472   : > { %v1963_v50 = vunpack.i.h.bf16 %v1961_v48  ;;  %v1962_v51 = vunpack.i.l.bf16 %v1961_v48 }
 0x474   : > { %v1399_v54 = vsel %vm363_vm9, %v1962_v51, %v1963_v50  ;;  %v1400_v55 = vsel %vm363_vm9, %v1963_v50, %v1962_v51 }
 0x475   : > { %v1401_v63 = vsel %vm2142_vm11, %v1399_v54, %v1394_v61  ;;  %v1402_v0 = vsel %vm2138_vm10, %v1400_v55, %v1393_v60  ;;  %v1485_v7 = vsel %vm2154_vm13, %v1394_v61, %v1399_v54  ;;  %v1486_v9 = vsel %vm2150_vm12, %v1393_v60, %v1400_v55  ;;  %v1818_v55 = vld [vmem:[%s2590_s5 + $0x6] sm:$0x3]  ;;  %v1821_v60 = vld [vmem:[%s2590_s5 + $0x8] sm:$0x3] }
 0x476   : > { %v1403_v38 = vpack.c.bf16 %v1401_v63, %v1401_v63  ;;  %v1404_v39 = vpack.c.bf16 %v1402_v0, %v1402_v0  ;;  %v1487_v40 = vpack.c.bf16 %v1485_v7, %v1485_v7  ;;  %v1488_v43 = vpack.c.bf16 %v1486_v9, %v1486_v9  ;;  %v1824_v63 = vld [vmem:[%s2590_s5 + $0xa] sm:$0x3]  ;;  %v1827_v0 = vld [vmem:[%s2590_s5 + $0xc] sm:$0x3] }
 0x478   : > { %v1411_v16 = vsel %vm379_vm6, %v1403_v38, 0  ;;  %v1414_v17 = vsel %vm379_vm6, %v1404_v39, 0  ;;  %v1495_v50 = vsel %vm379_vm6, %v1487_v40, 0  ;;  %v1498_v8 = vsel %vm379_vm6, %v1488_v43, 0 }
 0x480   : > { %v1951_v62 = vpop.permute.xlu0 %1950  ;;  %v1971_v32 = vpop.permute.xlu1 %1970 }
 0x481   : > { %v1953_v1 = vunpack.i.h.bf16 %v1951_v62  ;;  %v1952_v3 = vunpack.i.l.bf16 %v1951_v62  ;;  %v1973_v25 = vunpack.i.h.bf16 %v1971_v32  ;;  %v1972_v28 = vunpack.i.l.bf16 %v1971_v32 }
 0x483   : > { %v1265_v33 = vsel %vm363_vm9, %v1952_v3, %v1953_v1  ;;  %v1266_v10 = vsel %vm363_vm9, %v1953_v1, %v1952_v3  ;;  %v1540_v19 = vsel %vm363_vm9, %v1972_v28, %v1973_v25  ;;  %v1541_v26 = vsel %vm363_vm9, %v1973_v25, %v1972_v28  ;;  %v1830_v1 = vld [vmem:[%s2590_s5 + $0xe] sm:$0x3]  ;;  %v1833_v3 = vld [vmem:[%s2590_s5 + $0x10] sm:$0x3] }
 0x484   : > { %v1267_v11 = vsel %vm2142_vm11, %v1265_v33, %v1260_v6  ;;  %v1268_v12 = vsel %vm2138_vm10, %v1266_v10, %v1259_v5  ;;  %v1346_v13 = vsel %vm2154_vm13, %v1260_v6, %v1265_v33  ;;  %v1347_v14 = vsel %vm2150_vm12, %v1259_v5, %v1266_v10 }
 0x485   : > { %v1269_v15 = vpack.c.bf16 %v1267_v11, %v1267_v11  ;;  %v1270_v18 = vpack.c.bf16 %v1268_v12, %v1268_v12  ;;  %v1348_v23 = vpack.c.bf16 %v1346_v13, %v1346_v13  ;;  %v1349_v24 = vpack.c.bf16 %v1347_v14, %v1347_v14 }
 0x487   : > { %v1315_v31 = vsel %vm379_vm6, %v1269_v15, 0  ;;  %v1318_v34 = vsel %vm379_vm6, %v1270_v18, 0  ;;  %v1356_v35 = vsel %vm379_vm6, %v1348_v23, 0  ;;  %v1359_v36 = vsel %vm379_vm6, %v1349_v24, 0 }
 0x488   : > { %v1966_v37 = vpop.permute.xlu0 %1965  ;;  %1327 = vmatpush.bf16.msrb.mxu2 %v1315_v31  ;;  %1340 = vmatpush.bf16.msrb.mxu3 %v1318_v34 }
 0x489   : > { %v1968_v44 = vunpack.i.h.bf16 %v1966_v37  ;;  %v1967_v45 = vunpack.i.l.bf16 %v1966_v37  ;;  %1368 = vmatpush.bf16.msra.mxu0 %v1356_v35  ;;  %1381 = vmatpush.bf16.msra.mxu1 %v1359_v36 }
 0x48b   : > { %v1534_v27 = vsel %vm356_vm8, %v1967_v45, %v1968_v44  ;;  %v1535_v47 = vsel %vm356_vm8, %v1968_v44, %v1967_v45  ;;  %1813 = vmatmul.msk.bf16.vlgmr.msrb.gmra.mxu2 %vm375_vm7, %v1271_v46  ;;  %1814 = vmatmul.msk.bf16.vlgmr.msrb.gmra.mxu3 %vm375_vm7, %v1271_v46 }
 0x48c   : > { %1423 = vmatpush.bf16.msra.mxu2 %v1411_v16  ;;  %1436 = vmatpush.bf16.msra.mxu3 %v1414_v17  ;;  %v1542_v48 = vsel %vm2142_vm11, %v1540_v19, %v1535_v47  ;;  %v1543_v49 = vsel %vm2138_vm10, %v1541_v26, %v1534_v27  ;;  %v1626_v58 = vsel %vm2154_vm13, %v1535_v47, %v1540_v19 }
 0x48d   : > { %1464 = vmatpush.bf16.msrb.mxu0 %v1452_v20  ;;  %1477 = vmatpush.bf16.msrb.mxu1 %v1455_v21  ;;  %v1544_v51 = vpack.c.bf16 %v1542_v48, %v1542_v48  ;;  %v1545_v52 = vpack.c.bf16 %v1543_v49, %v1543_v49  ;;  %v1627_v54 = vsel %vm2150_vm12, %v1534_v27, %v1541_v26 }
 0x48e   : > { %1816 = vmatmul.msk.bf16.vlgmr.msra.gmra.mxu0 %vm375_vm7, %v1815_v22  ;;  %1817 = vmatmul.msk.bf16.vlgmr.msra.gmra.mxu1 %vm375_vm7, %v1815_v22  ;;  %v1628_v61 = vpack.c.bf16 %v1626_v58, %v1626_v58  ;;  %v1629_v4 = vpack.c.bf16 %v1627_v54, %v1627_v54 }
 0x48f   : > { %v1552_v53 = vsel %vm379_vm6, %v1544_v51, 0  ;;  %v1555_v59 = vsel %vm379_vm6, %v1545_v52, 0  ;;  %v1294_v5 = vpop.f32.mrf.mxu0 }
 0x490   : > { %1507 = vmatpush.bf16.msrb.mxu2 %v1495_v50  ;;  %1520 = vmatpush.bf16.msrb.mxu3 %v1498_v8  ;;  %v1636_v42 = vsel %vm379_vm6, %v1628_v61, 0  ;;  %v1639_v62 = vsel %vm379_vm6, %v1629_v4, 0  ;;  %v1307_v6 = vpop.f32.mrf.mxu1  ;;  %v1682_v61 = vld.sshfl [vmem:[#allocation1 + $0x8] sm:$0xff pattern:$0x75316420] }
 0x491   : > { %1564 = vmatpush.bf16.msra.mxu0 %v1552_v53  ;;  %1577 = vmatpush.bf16.msra.mxu1 %v1555_v59 }
 0x497   : > { %v1296_v7 = vpop.f32.mrf.mxu0 }
 0x498   : > { %v1309_v9 = vpop.f32.mrf.mxu1 }
 0x49b   : > { %1819 = vmatmul.msk.bf16.vlgmr.msra.gmra.mxu2 %vm375_vm7, %v1818_v55  ;;  %1820 = vmatmul.msk.bf16.vlgmr.msra.gmra.mxu3 %vm375_vm7, %v1818_v55  ;;  %v1673_v55 = vpop.permute.xlu2 %1672 }
 0x49c   : > { %1605 = vmatpush.bf16.msra.mxu2 %v1593_v2  ;;  %1618 = vmatpush.bf16.msra.mxu3 %v1596_v41  ;;  %v1681_v41 = vld.sshfl [vmem:[#allocation1] sm:$0xff pattern:$0x75316420] }
 0x49e   : > { %1822 = vmatmul.msk.bf16.vlgmr.msrb.gmra.mxu0 %vm375_vm7, %v1821_v60  ;;  %1823 = vmatmul.msk.bf16.vlgmr.msrb.gmra.mxu1 %vm375_vm7, %v1821_v60 }
 0x49f   : > { %1648 = vmatpush.bf16.msrb.mxu0 %v1636_v42  ;;  %1661 = vmatpush.bf16.msrb.mxu1 %v1639_v62 }
 0x4ab   : > { %1825 = vmatmul.msk.bf16.vlgmr.msrb.gmra.mxu2 %vm375_vm7, %v1824_v63  ;;  %1826 = vmatmul.msk.bf16.vlgmr.msrb.gmra.mxu3 %vm375_vm7, %v1824_v63 }
 0x4ae   : > { %1828 = vmatmul.msk.bf16.vlgmr.msra.gmra.mxu0 %vm375_vm7, %v1827_v0  ;;  %1829 = vmatmul.msk.bf16.vlgmr.msra.gmra.mxu1 %vm375_vm7, %v1827_v0 }
 0x4bb   : > { %1831 = vmatmul.msk.bf16.vlgmr.msra.gmra.mxu2 %vm375_vm7, %v1830_v1  ;;  %1832 = vmatmul.msk.bf16.vlgmr.msra.gmra.mxu3 %vm375_vm7, %v1830_v1 }
 0x4be   : > { %1834 = vmatmul.msk.bf16.vlgmr.msrb.gmra.mxu0 %vm375_vm7, %v1833_v3  ;;  %1835 = vmatmul.msk.bf16.vlgmr.msrb.gmra.mxu1 %vm375_vm7, %v1833_v3 }
 0x50b   : > { %v1370_v32 = vpop.f32.mrf.mxu0  ;;  %v1383_v33 = vpop.f32.mrf.mxu1 }
 0x50e   : > { %v1329_v10 = vpop.f32.mrf.mxu2  ;;  %v1342_v38 = vpop.f32.mrf.mxu3 }
 0x50f   : > { %v1330_v34 = vadd.f32 %v1329_v10, %v1294_v5  ;;  %v1343_v35 = vadd.f32 %v1342_v38, %v1307_v6 }
 0x511   : > { %v1387_v40 = vadd.f32 %v1370_v32, %v1330_v34  ;;  %v1388_v43 = vadd.f32 %v1383_v33, %v1343_v35 }
 0x513   : > { %v1372_v39 = vpop.f32.mrf.mxu0  ;;  %v1385_v11 = vpop.f32.mrf.mxu1 }
 0x516   : > { %v1331_v12 = vpop.f32.mrf.mxu2  ;;  %v1344_v13 = vpop.f32.mrf.mxu3 }
 0x51b   : > { %v1466_v14 = vpop.f32.mrf.mxu0  ;;  %v1479_v15 = vpop.f32.mrf.mxu1 }
 0x51e   : > { %v1425_v18 = vpop.f32.mrf.mxu2  ;;  %v1438_v23 = vpop.f32.mrf.mxu3 }
 0x51f   : > { %v1442_v16 = vadd.f32 %v1425_v18, %v1387_v40  ;;  %v1443_v17 = vadd.f32 %v1438_v23, %v1388_v43 }
 0x521   : > { %v1483_v20 = vadd.f32 %v1466_v14, %v1442_v16  ;;  %v1484_v21 = vadd.f32 %v1479_v15, %v1443_v17 }
 0x523   : > { %v1468_v24 = vpop.f32.mrf.mxu0  ;;  %v1481_v25 = vpop.f32.mrf.mxu1 }
 0x526   : > { %v1427_v28 = vpop.f32.mrf.mxu2  ;;  %v1440_v29 = vpop.f32.mrf.mxu3 }
 0x52b   : > { %v1566_v30 = vpop.f32.mrf.mxu0  ;;  %v1579_v31 = vpop.f32.mrf.mxu1 }
 0x52e   : > { %v1509_v36 = vpop.f32.mrf.mxu2  ;;  %v1522_v37 = vpop.f32.mrf.mxu3 }
 0x52f   : > { %v1526_v22 = vadd.f32 %v1509_v36, %v1483_v20  ;;  %v1527_v26 = vadd.f32 %v1522_v37, %v1484_v21 }
 0x531   : > { %v1583_v48 = vadd.f32 %v1566_v30, %v1526_v22  ;;  %v1584_v49 = vadd.f32 %v1579_v31, %v1527_v26 }
 0x533   : > { %v1568_v44 = vpop.f32.mrf.mxu0  ;;  %v1581_v45 = vpop.f32.mrf.mxu1 }
 0x536   : > { %v1511_v46 = vpop.f32.mrf.mxu2  ;;  %v1524_v19 = vpop.f32.mrf.mxu3 }
 0x53b   : > { %v1650_v27 = vpop.f32.mrf.mxu0  ;;  %v1663_v47 = vpop.f32.mrf.mxu1 }
 0x53e   : > { %v1607_v50 = vpop.f32.mrf.mxu2  ;;  %v1620_v8 = vpop.f32.mrf.mxu3 }
 0x53f   : > { %v1624_v51 = vadd.f32 %v1607_v50, %v1583_v48  ;;  %v1625_v52 = vadd.f32 %v1620_v8, %v1584_v49 }
 0x541   : > { %v1667_v53 = vadd.f32 %v1650_v27, %v1624_v51  ;;  %v1668_v59 = vadd.f32 %v1663_v47, %v1625_v52 }
 0x543   : > { %v1665_v58 = vpop.f32.mrf.mxu1  ;;  %v1652_v54 = vpop.f32.mrf.mxu0  ;;  %v1675_v57 = vadd.f32 %v1673_v55, %v1667_v53  ;;  %v1676_v60 = vadd.f32 %v1673_v55, %v1668_v59 }
 0x545   : > { %v1678_v4 = vmul.f32 %v1677_v56, %v1675_v57  ;;  %v1679_v2 = vmul.f32 %v1677_v56, %v1676_v60 }
 0x546   : > { %v1622_v42 = vpop.f32.mrf.mxu3  ;;  %v1609_v62 = vpop.f32.mrf.mxu2 }
 0x547   : > { %v1686_v63 = vadd.f32 %v1682_v61, %v1679_v2  ;;  %v1685_v0 = vadd.f32 %v1681_v41, %v1678_v4 }
 0x549   : > { %v1689_v1 = vrot.slane %v1686_v63, 4 }
 0x54b   : > { %v1691_v3 = vsel %vm1690_vm0, %v1685_v0, %v1689_v1 }
 0x54c   : > { %1693 = vst [vmem:[%s306_s25] sm:$0xff] %v1691_v3 }
 0x54d PF: > { %s19_s29 = sadd.s32 1, %s1981_s29  }
 0x54e   : > { %p16_p4 = scmp.ge.s32.totalorder %s19_s29, 4  }
 0x550   :  { %18 = sbr.rel (!%p16_p4) target bundleno = 2 (0x2), region = 106 }

</bundles_post_ra>
